<compile_context>
chip_gen: v5e
topology: v5e:2x2
jax: 0.10.0
libtpu: 0.0.40
codegen_flags: <defaults>
</compile_context>

<pallas_src>
import math

import jax
import jax.numpy as jnp
from jax.experimental import pallas as pl
from jax.experimental.pallas import tpu as pltpu

S = 8          # padded sequence length
H = 128        # hidden size (lane aligned)
F = 256        # FFN intermediate size
V = 64         # toy vocab size
NB = 8         # sequences per grid block (sublane aligned)
NUM_LABEL = 5
BATCH_ITEMS = 2


# ----------------------------- Pallas kernel ------------------------------- #

def _csqa_kernel(ids_ref, mask_ref, pos_ref, tok_emb_ref,
                 wqkv_ref, wo_ref, ln1g_ref, ln1b_ref,
                 w1_ref, b1_ref, w2_ref, b2_ref, ln2g_ref, ln2b_ref,
                 wp_ref, bp_ref, wc_ref, bc_ref,
                 out_ref):
    """Embedding -> 1 encoder layer -> pooler -> 1-logit head for NB sequences."""
    f32 = jnp.float32
    bf16 = jnp.bfloat16
    T = NB * S                                           # token rows in block

    # ---- fused embedding lookup: one-hot (T,V) @ tok_emb (V,H) on the MXU
    ids = ids_ref[...]                                   # (T, 1) int32
    vocab_iota = jax.lax.broadcasted_iota(jnp.int32, (T, V), 1)
    onehot = (ids == vocab_iota).astype(bf16)            # (T, V)
    x = jnp.dot(onehot, tok_emb_ref[...], preferred_element_type=f32)   # (T,H)
    x = x.reshape(NB, S, H) + pos_ref[...][None]         # (NB, S, H) f32

    # ---- fused QKV projection (1/sqrt(H) folded into the Q columns at init)
    xf = x.reshape(T, H).astype(bf16)
    qkv = jnp.dot(xf, wqkv_ref[...], preferred_element_type=f32)        # (T,3H)
    q = qkv[:, :H].reshape(NB, S, H).astype(bf16)
    k = qkv[:, H:2 * H].reshape(NB, S, H).astype(bf16)
    v = qkv[:, 2 * H:].reshape(NB, S, H).astype(bf16)

    # ---- attention over each sequence (padded keys masked out)
    scores = jnp.einsum('nqd,nkd->nqk', q, k, preferred_element_type=f32)
    scores = scores + (mask_ref[...] - 1.0) * 1e9        # (NB, S, S)
    m = jnp.max(scores, axis=-1, keepdims=True)
    e = jnp.exp(scores - m)
    probs = e * pl.reciprocal(jnp.sum(e, axis=-1, keepdims=True), approx=True)
    ctx = jnp.einsum('nqk,nkd->nqd', probs.astype(bf16), v,
                     preferred_element_type=f32)         # (NB, S, H)

    # ---- only the CLS row is consumed downstream; drop the other tokens here
    ctx_cls = ctx[:, 0, :]                               # (NB, H)
    x_cls = x[:, 0, :]
    attn_cls = jnp.dot(ctx_cls.astype(bf16), wo_ref[...],
                       preferred_element_type=f32)

    # residual + layernorm 1 (f32)
    h = x_cls + attn_cls
    mu = jnp.mean(h, axis=-1, keepdims=True)
    var = jnp.mean(jnp.square(h - mu), axis=-1, keepdims=True)
    h = (h - mu) * jax.lax.rsqrt(var + 1e-5) * ln1g_ref[...] + ln1b_ref[...]

    # feed-forward (GELU; HF exact GELU would use approximate=False)
    ff = jnp.dot(h.astype(bf16), w1_ref[...], preferred_element_type=f32) + b1_ref[...]
    ff = jax.nn.gelu(ff)
    ff = jnp.dot(ff.astype(bf16), w2_ref[...], preferred_element_type=f32) + b2_ref[...]

    # residual + layernorm 2 (f32)
    y = h + ff
    mu2 = jnp.mean(y, axis=-1, keepdims=True)
    var2 = jnp.mean(jnp.square(y - mu2), axis=-1, keepdims=True)
    y = (y - mu2) * jax.lax.rsqrt(var2 + 1e-5) * ln2g_ref[...] + ln2b_ref[...]

    # ---- pooler (tanh) + 1-logit head; lane-reduce instead of a 1-column MXU
    pooled = jnp.tanh(jnp.dot(y.astype(bf16), wp_ref[...],
                              preferred_element_type=f32) + bp_ref[...])
    logit = jnp.sum(pooled * wc_ref[...], axis=-1, keepdims=True) + bc_ref[...]

    # lane-dense output: broadcast the logit across 128 lanes (avoids vst.msk)
    out_ref[...] = jnp.broadcast_to(logit, (NB, 128))


# ------------------------------ JAX wrapper --------------------------------- #

_WEIGHT_NAMES = ("pos_emb", "tok_emb", "wqkv", "wo", "ln1g", "ln1b",
                 "w1", "b1", "w2", "b2", "ln2g", "ln2b",
                 "wp", "bp", "wc", "bc")


def csqa_forward(token_ids, attention_mask, params, num_label):
    """Mirrors CSQAModel.forward on pre-tokenized inputs.

    token_ids / attention_mask: (N, S), N = num_items * num_label.
    Returns scores of shape (N // num_label, num_label).
    """
    # TODO(synk): AutoTokenizer (host-side string processing) has no Pallas
    # equivalent; inputs arrive pre-tokenized as integer ids + attention mask.
    n = token_ids.shape[0]
    n_pad = ((n + NB - 1) // NB) * NB                     # pad to grid blocks
    pad = n_pad - n

    # Padded sequences get id 0 / mask 0; their (garbage but finite) logits
    # are discarded below, and the softmax stays NaN-free (max subtracted).
    ids = jnp.pad(token_ids.astype(jnp.int32), ((0, pad), (0, 0)))
    ids = ids.reshape(n_pad * S, 1)
    mask3 = jnp.pad(attention_mask.astype(jnp.float32), ((0, pad), (0, 0)))
    mask3 = mask3.reshape(n_pad, 1, S)

    def full_spec(arr):
        return pl.BlockSpec(arr.shape, lambda i: (0, 0))   # all weights rank-2

    in_specs = [
        pl.BlockSpec((NB * S, 1), lambda i: (i, 0)),        # token ids
        pl.BlockSpec((NB, 1, S), lambda i: (i, 0, 0)),      # attention mask
    ] + [full_spec(params[name]) for name in _WEIGHT_NAMES]

    out = pl.pallas_call(
        _csqa_kernel,
        out_shape=jax.ShapeDtypeStruct((n_pad, 128), jnp.float32),
        grid=(n_pad // NB,),
        in_specs=in_specs,
        out_specs=pl.BlockSpec((NB, 128), lambda i: (i, 0)),
        compiler_params=pltpu.CompilerParams(
            dimension_semantics=("parallel",)),             # 2 TCs on v7x
    )(ids, mask3, *[params[name] for name in _WEIGHT_NAMES])

    scores = out[:n, 0]                                    # squeeze(-1)
    return scores.reshape(n // num_label, num_label)


# ----------------------------- parameter setup ------------------------------ #

def init_params(key):
    ks = jax.random.split(key, 10)

    def nrm(k, shape, scale=0.02):
        return (scale * jax.random.normal(k, shape)).astype(jnp.float32)

    # fuse Wq/Wk/Wv and fold the 1/sqrt(H) attention scale into the Q columns
    wq = nrm(ks[2], (H, H)) * (1.0 / math.sqrt(H))
    wk = nrm(ks[3], (H, H))
    wv = nrm(ks[4], (H, H))
    wqkv = jnp.concatenate([wq, wk, wv], axis=1)

    return dict(
        tok_emb=nrm(ks[0], (V, H)).astype(jnp.bfloat16),
        pos_emb=nrm(ks[1], (S, H)),
        wqkv=wqkv.astype(jnp.bfloat16),
        wo=nrm(ks[5], (H, H)).astype(jnp.bfloat16),
        ln1g=jnp.ones((1, H), jnp.float32), ln1b=jnp.zeros((1, H), jnp.float32),
        w1=nrm(ks[6], (H, F)).astype(jnp.bfloat16),
        b1=jnp.zeros((1, F), jnp.float32),
        w2=nrm(ks[7], (F, H)).astype(jnp.bfloat16),
        b2=jnp.zeros((1, H), jnp.float32),
        ln2g=jnp.ones((1, H), jnp.float32), ln2b=jnp.zeros((1, H), jnp.float32),
        wp=nrm(ks[8], (H, H)).astype(jnp.bfloat16),
        bp=jnp.zeros((1, H), jnp.float32),
        wc=nrm(ks[9], (H, 1)).reshape(1, H),   # stored as a row for lane reduce
        bc=jnp.zeros((1, 1), jnp.float32),
    )


if __name__ == "__main__":
    key = jax.random.PRNGKey(0)
    k_tok, k_len, k_par = jax.random.split(key, 3)

    n_seq = BATCH_ITEMS * NUM_LABEL            # 2 items x 5 choices = 10 pairs
    token_ids = jax.random.randint(k_tok, (n_seq, S), 0, V, dtype=jnp.int32)
    lengths = jax.random.randint(k_len, (n_seq,), 3, S + 1, dtype=jnp.int32)
    attention_mask = (jnp.arange(S)[None, :] < lengths[:, None]).astype(jnp.int32)

    params = init_params(k_par)

    scores = csqa_forward(token_ids, attention_mask, params, NUM_LABEL)
    scores = jax.block_until_ready(scores)
    assert scores.shape == (BATCH_ITEMS, NUM_LABEL)
    assert scores.dtype == jnp.float32
    print("KERNEL_OK")
</pallas_src>

<mosaic_0001>
module attributes {stable_mosaic.version = 11 : i64} {
  func.func @_csqa_kernel(%arg0: i32, %arg1: memref<64x1xi32, #tpu.memory_space<vmem>>, %arg2: memref<8x1x8xf32, #tpu.memory_space<vmem>>, %arg3: memref<8x128xf32, #tpu.memory_space<vmem>>, %arg4: memref<64x128xbf16, #tpu.memory_space<vmem>>, %arg5: memref<128x384xbf16, #tpu.memory_space<vmem>>, %arg6: memref<128x128xbf16, #tpu.memory_space<vmem>>, %arg7: memref<1x128xf32, #tpu.memory_space<vmem>>, %arg8: memref<1x128xf32, #tpu.memory_space<vmem>>, %arg9: memref<128x256xbf16, #tpu.memory_space<vmem>>, %arg10: memref<1x256xf32, #tpu.memory_space<vmem>>, %arg11: memref<256x128xbf16, #tpu.memory_space<vmem>>, %arg12: memref<1x128xf32, #tpu.memory_space<vmem>>, %arg13: memref<1x128xf32, #tpu.memory_space<vmem>>, %arg14: memref<1x128xf32, #tpu.memory_space<vmem>>, %arg15: memref<128x128xbf16, #tpu.memory_space<vmem>>, %arg16: memref<1x128xf32, #tpu.memory_space<vmem>>, %arg17: memref<1x128xf32, #tpu.memory_space<vmem>>, %arg18: memref<1x1xf32, #tpu.memory_space<vmem>>, %arg19: memref<8x128xf32, #tpu.memory_space<vmem>>) attributes {dimension_semantics = [#tpu.dimension_semantics<parallel>], iteration_bounds = array<i64: 2>, scalar_prefetch = 0 : i64, scratch_operands = 0 : i64, tpu.core_type = #tpu.core_type<tc>, window_params = [{transform_indices = @transform_0, window_bounds = array<i64: 64, 1>}, {transform_indices = @transform_1, window_bounds = array<i64: 8, 1, 8>}, {pipeline_mode = #tpu.pipeline_mode<synchronous>, transform_indices = @transform_2, window_bounds = array<i64: 8, 128>}, {pipeline_mode = #tpu.pipeline_mode<synchronous>, transform_indices = @transform_3, window_bounds = array<i64: 64, 128>}, {pipeline_mode = #tpu.pipeline_mode<synchronous>, transform_indices = @transform_4, window_bounds = array<i64: 128, 384>}, {pipeline_mode = #tpu.pipeline_mode<synchronous>, transform_indices = @transform_5, window_bounds = array<i64: 128, 128>}, {pipeline_mode = #tpu.pipeline_mode<synchronous>, transform_indices = @transform_6, window_bounds = array<i64: 1, 128>}, {pipeline_mode = #tpu.pipeline_mode<synchronous>, transform_indices = @transform_7, window_bounds = array<i64: 1, 128>}, {pipeline_mode = #tpu.pipeline_mode<synchronous>, transform_indices = @transform_8, window_bounds = array<i64: 128, 256>}, {pipeline_mode = #tpu.pipeline_mode<synchronous>, transform_indices = @transform_9, window_bounds = array<i64: 1, 256>}, {pipeline_mode = #tpu.pipeline_mode<synchronous>, transform_indices = @transform_10, window_bounds = array<i64: 256, 128>}, {pipeline_mode = #tpu.pipeline_mode<synchronous>, transform_indices = @transform_11, window_bounds = array<i64: 1, 128>}, {pipeline_mode = #tpu.pipeline_mode<synchronous>, transform_indices = @transform_12, window_bounds = array<i64: 1, 128>}, {pipeline_mode = #tpu.pipeline_mode<synchronous>, transform_indices = @transform_13, window_bounds = array<i64: 1, 128>}, {pipeline_mode = #tpu.pipeline_mode<synchronous>, transform_indices = @transform_14, window_bounds = array<i64: 128, 128>}, {pipeline_mode = #tpu.pipeline_mode<synchronous>, transform_indices = @transform_15, window_bounds = array<i64: 1, 128>}, {pipeline_mode = #tpu.pipeline_mode<synchronous>, transform_indices = @transform_16, window_bounds = array<i64: 1, 128>}, {pipeline_mode = #tpu.pipeline_mode<synchronous>, transform_indices = @transform_17, window_bounds = array<i64: 1, 1>}, {transform_indices = @transform_18, window_bounds = array<i64: 8, 128>}]} {
    %c0 = arith.constant 0 : index
    %c0_0 = arith.constant 0 : index
    %0 = vector.load %arg1[%c0, %c0_0] : memref<64x1xi32, #tpu.memory_space<vmem>>, vector<64x1xi32>
    %1 = tpu.iota {dimensions = array<i32: 1>} : vector<64x64xi32>
    %2 = vector.broadcast %0 : vector<64x1xi32> to vector<64x64xi32>
    %3 = arith.cmpi eq, %2, %1 : vector<64x64xi32>
    %4 = arith.extui %3 : vector<64x64xi1> to vector<64x64xi32>
    %5 = arith.sitofp %4 : vector<64x64xi32> to vector<64x64xf32>
    %6 = arith.truncf %5 : vector<64x64xf32> to vector<64x64xbf16>
    %c0_1 = arith.constant 0 : index
    %c0_2 = arith.constant 0 : index
    %7 = vector.load %arg4[%c0_1, %c0_2] : memref<64x128xbf16, #tpu.memory_space<vmem>>, vector<64x128xbf16>
    %cst = arith.constant dense<0.000000e+00> : vector<64x128xf32>
    %8 = tpu.matmul %6, %7, %cst {dimension_numbers = #tpu.dot_dimension_numbers<[1], [0], [0], [1], [0, 0, 1, 1], [], []>} : vector<64x64xbf16>, vector<64x128xbf16>, vector<64x128xf32> -> vector<64x128xf32>
    %9 = vector.shape_cast %8 : vector<64x128xf32> to vector<8x8x128xf32>
    %c0_3 = arith.constant 0 : index
    %c0_4 = arith.constant 0 : index
    %10 = vector.load %arg3[%c0_3, %c0_4] : memref<8x128xf32, #tpu.memory_space<vmem>>, vector<8x128xf32>
    %11 = vector.shape_cast %10 : vector<8x128xf32> to vector<1x8x128xf32>
    %12 = vector.broadcast %11 : vector<1x8x128xf32> to vector<8x8x128xf32>
    %13 = arith.addf %9, %12 : vector<8x8x128xf32>
    %14 = vector.shape_cast %13 : vector<8x8x128xf32> to vector<64x128xf32>
    %15 = arith.truncf %14 : vector<64x128xf32> to vector<64x128xbf16>
    %c0_5 = arith.constant 0 : index
    %c0_6 = arith.constant 0 : index
    %16 = vector.load %arg5[%c0_5, %c0_6] : memref<128x384xbf16, #tpu.memory_space<vmem>>, vector<128x384xbf16>
    %cst_7 = arith.constant dense<0.000000e+00> : vector<64x384xf32>
    %17 = tpu.matmul %15, %16, %cst_7 {dimension_numbers = #tpu.dot_dimension_numbers<[1], [0], [0], [1], [0, 0, 1, 1], [], []>} : vector<64x128xbf16>, vector<128x384xbf16>, vector<64x384xf32> -> vector<64x384xf32>
    %18 = vector.extract_strided_slice %17 {offsets = [0, 0], sizes = [64, 128], strides = [1, 1]} : vector<64x384xf32> to vector<64x128xf32>
    %19 = vector.shape_cast %18 : vector<64x128xf32> to vector<8x8x128xf32>
    %20 = arith.truncf %19 : vector<8x8x128xf32> to vector<8x8x128xbf16>
    %21 = vector.extract_strided_slice %17 {offsets = [0, 128], sizes = [64, 128], strides = [1, 1]} : vector<64x384xf32> to vector<64x128xf32>
    %22 = vector.shape_cast %21 : vector<64x128xf32> to vector<8x8x128xf32>
    %23 = arith.truncf %22 : vector<8x8x128xf32> to vector<8x8x128xbf16>
    %24 = vector.extract_strided_slice %17 {offsets = [0, 256], sizes = [64, 128], strides = [1, 1]} : vector<64x384xf32> to vector<64x128xf32>
    %25 = vector.shape_cast %24 : vector<64x128xf32> to vector<8x8x128xf32>
    %26 = arith.truncf %25 : vector<8x8x128xf32> to vector<8x8x128xbf16>
    "tpu.trace_start"() <{level = 10 : i32, message = "nqd,nkd->nqk"}> : () -> ()
    %cst_8 = arith.constant dense<0.000000e+00> : vector<8x8x8xf32>
    %27 = tpu.matmul %20, %23, %cst_8 {dimension_numbers = #tpu.dot_dimension_numbers<[2], [2], [1], [1], [0, 0, 0, 1, 1, 1], [0], [0]>} : vector<8x8x128xbf16>, vector<8x8x128xbf16>, vector<8x8x8xf32> -> vector<8x8x8xf32>
    "tpu.trace_stop"() : () -> ()
    %c0_9 = arith.constant 0 : index
    %c0_10 = arith.constant 0 : index
    %c0_11 = arith.constant 0 : index
    %28 = vector.load %arg2[%c0_9, %c0_10, %c0_11] : memref<8x1x8xf32, #tpu.memory_space<vmem>>, vector<8x1x8xf32>
    %cst_12 = arith.constant 1.000000e+00 : f32
    %29 = vector.broadcast %cst_12 : f32 to vector<8x1x8xf32>
    %30 = arith.subf %28, %29 : vector<8x1x8xf32>
    %cst_13 = arith.constant 1.000000e+09 : f32
    %31 = vector.broadcast %cst_13 : f32 to vector<8x1x8xf32>
    %32 = arith.mulf %30, %31 : vector<8x1x8xf32>
    %33 = vector.broadcast %32 : vector<8x1x8xf32> to vector<8x8x8xf32>
    %34 = arith.addf %27, %33 : vector<8x8x8xf32>
    %cst_14 = arith.constant dense<0xFF800000> : vector<8x8xf32>
    %35 = vector.multi_reduction <maximumf>, %34, %cst_14 [2] : vector<8x8x8xf32> to vector<8x8xf32>
    %36 = vector.shape_cast %35 : vector<8x8xf32> to vector<8x8x1xf32>
    %37 = vector.broadcast %36 : vector<8x8x1xf32> to vector<8x8x8xf32>
    %38 = arith.subf %34, %37 : vector<8x8x8xf32>
    %39 = math.exp %38 : vector<8x8x8xf32>
    %cst_15 = arith.constant dense<0.000000e+00> : vector<8x8xf32>
    %40 = vector.multi_reduction <add>, %39, %cst_15 [2] : vector<8x8x8xf32> to vector<8x8xf32>
    %41 = vector.shape_cast %40 : vector<8x8xf32> to vector<8x8x1xf32>
    %42 = tpu.reciprocal %41 {approx = true} : vector<8x8x1xf32> -> vector<8x8x1xf32>
    %43 = vector.broadcast %42 : vector<8x8x1xf32> to vector<8x8x8xf32>
    %44 = arith.mulf %39, %43 : vector<8x8x8xf32>
    %45 = arith.truncf %44 : vector<8x8x8xf32> to vector<8x8x8xbf16>
    "tpu.trace_start"() <{level = 10 : i32, message = "nqk,nkd->nqd"}> : () -> ()
    %cst_16 = arith.constant dense<0.000000e+00> : vector<8x8x128xf32>
    %46 = tpu.matmul %45, %26, %cst_16 {dimension_numbers = #tpu.dot_dimension_numbers<[2], [1], [1], [2], [0, 0, 0, 1, 1, 2], [0], [0]>} : vector<8x8x8xbf16>, vector<8x8x128xbf16>, vector<8x8x128xf32> -> vector<8x8x128xf32>
    "tpu.trace_stop"() : () -> ()
    %47 = vector.extract_strided_slice %46 {offsets = [0, 0, 0], sizes = [8, 1, 128], strides = [1, 1, 1]} : vector<8x8x128xf32> to vector<8x1x128xf32>
    %48 = vector.shape_cast %47 : vector<8x1x128xf32> to vector<8x128xf32>
    %49 = vector.extract_strided_slice %13 {offsets = [0, 0, 0], sizes = [8, 1, 128], strides = [1, 1, 1]} : vector<8x8x128xf32> to vector<8x1x128xf32>
    %50 = vector.shape_cast %49 : vector<8x1x128xf32> to vector<8x128xf32>
    %51 = arith.truncf %48 : vector<8x128xf32> to vector<8x128xbf16>
    %c0_17 = arith.constant 0 : index
    %c0_18 = arith.constant 0 : index
    %52 = vector.load %arg6[%c0_17, %c0_18] : memref<128x128xbf16, #tpu.memory_space<vmem>>, vector<128x128xbf16>
    %cst_19 = arith.constant dense<0.000000e+00> : vector<8x128xf32>
    %53 = tpu.matmul %51, %52, %cst_19 {dimension_numbers = #tpu.dot_dimension_numbers<[1], [0], [0], [1], [0, 0, 1, 1], [], []>} : vector<8x128xbf16>, vector<128x128xbf16>, vector<8x128xf32> -> vector<8x128xf32>
    %54 = arith.addf %50, %53 : vector<8x128xf32>
    %cst_20 = arith.constant dense<0.000000e+00> : vector<8xf32>
    %55 = vector.multi_reduction <add>, %54, %cst_20 [1] : vector<8x128xf32> to vector<8xf32>
    %56 = vector.shape_cast %55 : vector<8xf32> to vector<8x1xf32>
    %cst_21 = arith.constant 1.280000e+02 : f32
    %57 = vector.broadcast %cst_21 : f32 to vector<8x1xf32>
    %58 = arith.divf %56, %57 : vector<8x1xf32>
    %59 = vector.broadcast %58 : vector<8x1xf32> to vector<8x128xf32>
    %60 = arith.subf %54, %59 : vector<8x128xf32>
    %61 = arith.mulf %60, %60 : vector<8x128xf32>
    %cst_22 = arith.constant dense<0.000000e+00> : vector<8xf32>
    %62 = vector.multi_reduction <add>, %61, %cst_22 [1] : vector<8x128xf32> to vector<8xf32>
    %63 = vector.shape_cast %62 : vector<8xf32> to vector<8x1xf32>
    %cst_23 = arith.constant 1.280000e+02 : f32
    %64 = vector.broadcast %cst_23 : f32 to vector<8x1xf32>
    %65 = arith.divf %63, %64 : vector<8x1xf32>
    %66 = vector.broadcast %58 : vector<8x1xf32> to vector<8x128xf32>
    %67 = arith.subf %54, %66 : vector<8x128xf32>
    %cst_24 = arith.constant 9.99999974E-6 : f32
    %68 = vector.broadcast %cst_24 : f32 to vector<8x1xf32>
    %69 = arith.addf %65, %68 : vector<8x1xf32>
    %70 = math.rsqrt %69 : vector<8x1xf32>
    %71 = vector.broadcast %70 : vector<8x1xf32> to vector<8x128xf32>
    %72 = arith.mulf %67, %71 : vector<8x128xf32>
    %c0_25 = arith.constant 0 : index
    %c0_26 = arith.constant 0 : index
    %73 = vector.load %arg7[%c0_25, %c0_26] : memref<1x128xf32, #tpu.memory_space<vmem>>, vector<1x128xf32>
    %74 = vector.broadcast %73 : vector<1x128xf32> to vector<8x128xf32>
    %75 = arith.mulf %72, %74 : vector<8x128xf32>
    %c0_27 = arith.constant 0 : index
    %c0_28 = arith.constant 0 : index
    %76 = vector.load %arg8[%c0_27, %c0_28] : memref<1x128xf32, #tpu.memory_space<vmem>>, vector<1x128xf32>
    %77 = vector.broadcast %76 : vector<1x128xf32> to vector<8x128xf32>
    %78 = arith.addf %75, %77 : vector<8x128xf32>
    %79 = arith.truncf %78 : vector<8x128xf32> to vector<8x128xbf16>
    %c0_29 = arith.constant 0 : index
    %c0_30 = arith.constant 0 : index
    %80 = vector.load %arg9[%c0_29, %c0_30] : memref<128x256xbf16, #tpu.memory_space<vmem>>, vector<128x256xbf16>
    %cst_31 = arith.constant dense<0.000000e+00> : vector<8x256xf32>
    %81 = tpu.matmul %79, %80, %cst_31 {dimension_numbers = #tpu.dot_dimension_numbers<[1], [0], [0], [1], [0, 0, 1, 1], [], []>} : vector<8x128xbf16>, vector<128x256xbf16>, vector<8x256xf32> -> vector<8x256xf32>
    %c0_32 = arith.constant 0 : index
    %c0_33 = arith.constant 0 : index
    %82 = vector.load %arg10[%c0_32, %c0_33] : memref<1x256xf32, #tpu.memory_space<vmem>>, vector<1x256xf32>
    %83 = vector.broadcast %82 : vector<1x256xf32> to vector<8x256xf32>
    %84 = arith.addf %81, %83 : vector<8x256xf32>
    %85 = arith.mulf %84, %84 : vector<8x256xf32>
    %86 = arith.mulf %84, %85 : vector<8x256xf32>
    %cst_34 = arith.constant 4.471500e-02 : f32
    %87 = vector.broadcast %cst_34 : f32 to vector<8x256xf32>
    %88 = arith.mulf %87, %86 : vector<8x256xf32>
    %89 = arith.addf %84, %88 : vector<8x256xf32>
    %cst_35 = arith.constant 0.797884583 : f32
    %90 = vector.broadcast %cst_35 : f32 to vector<8x256xf32>
    %91 = arith.mulf %90, %89 : vector<8x256xf32>
    %92 = math.tanh %91 : vector<8x256xf32>
    %cst_36 = arith.constant 1.000000e+00 : f32
    %93 = vector.broadcast %cst_36 : f32 to vector<8x256xf32>
    %94 = arith.addf %93, %92 : vector<8x256xf32>
    %cst_37 = arith.constant 5.000000e-01 : f32
    %95 = vector.broadcast %cst_37 : f32 to vector<8x256xf32>
    %96 = arith.mulf %95, %94 : vector<8x256xf32>
    %97 = arith.mulf %84, %96 : vector<8x256xf32>
    %98 = arith.truncf %97 : vector<8x256xf32> to vector<8x256xbf16>
    %c0_38 = arith.constant 0 : index
    %c0_39 = arith.constant 0 : index
    %99 = vector.load %arg11[%c0_38, %c0_39] : memref<256x128xbf16, #tpu.memory_space<vmem>>, vector<256x128xbf16>
    %cst_40 = arith.constant dense<0.000000e+00> : vector<8x128xf32>
    %100 = tpu.matmul %98, %99, %cst_40 {dimension_numbers = #tpu.dot_dimension_numbers<[1], [0], [0], [1], [0, 0, 1, 1], [], []>} : vector<8x256xbf16>, vector<256x128xbf16>, vector<8x128xf32> -> vector<8x128xf32>
    %c0_41 = arith.constant 0 : index
    %c0_42 = arith.constant 0 : index
    %101 = vector.load %arg12[%c0_41, %c0_42] : memref<1x128xf32, #tpu.memory_space<vmem>>, vector<1x128xf32>
    %102 = vector.broadcast %101 : vector<1x128xf32> to vector<8x128xf32>
    %103 = arith.addf %100, %102 : vector<8x128xf32>
    %104 = arith.addf %78, %103 : vector<8x128xf32>
    %cst_43 = arith.constant dense<0.000000e+00> : vector<8xf32>
    %105 = vector.multi_reduction <add>, %104, %cst_43 [1] : vector<8x128xf32> to vector<8xf32>
    %106 = vector.shape_cast %105 : vector<8xf32> to vector<8x1xf32>
    %cst_44 = arith.constant 1.280000e+02 : f32
    %107 = vector.broadcast %cst_44 : f32 to vector<8x1xf32>
    %108 = arith.divf %106, %107 : vector<8x1xf32>
    %109 = vector.broadcast %108 : vector<8x1xf32> to vector<8x128xf32>
    %110 = arith.subf %104, %109 : vector<8x128xf32>
    %111 = arith.mulf %110, %110 : vector<8x128xf32>
    %cst_45 = arith.constant dense<0.000000e+00> : vector<8xf32>
    %112 = vector.multi_reduction <add>, %111, %cst_45 [1] : vector<8x128xf32> to vector<8xf32>
    %113 = vector.shape_cast %112 : vector<8xf32> to vector<8x1xf32>
    %cst_46 = arith.constant 1.280000e+02 : f32
    %114 = vector.broadcast %cst_46 : f32 to vector<8x1xf32>
    %115 = arith.divf %113, %114 : vector<8x1xf32>
    %116 = vector.broadcast %108 : vector<8x1xf32> to vector<8x128xf32>
    %117 = arith.subf %104, %116 : vector<8x128xf32>
    %cst_47 = arith.constant 9.99999974E-6 : f32
    %118 = vector.broadcast %cst_47 : f32 to vector<8x1xf32>
    %119 = arith.addf %115, %118 : vector<8x1xf32>
    %120 = math.rsqrt %119 : vector<8x1xf32>
    %121 = vector.broadcast %120 : vector<8x1xf32> to vector<8x128xf32>
    %122 = arith.mulf %117, %121 : vector<8x128xf32>
    %c0_48 = arith.constant 0 : index
    %c0_49 = arith.constant 0 : index
    %123 = vector.load %arg13[%c0_48, %c0_49] : memref<1x128xf32, #tpu.memory_space<vmem>>, vector<1x128xf32>
    %124 = vector.broadcast %123 : vector<1x128xf32> to vector<8x128xf32>
    %125 = arith.mulf %122, %124 : vector<8x128xf32>
    %c0_50 = arith.constant 0 : index
    %c0_51 = arith.constant 0 : index
    %126 = vector.load %arg14[%c0_50, %c0_51] : memref<1x128xf32, #tpu.memory_space<vmem>>, vector<1x128xf32>
    %127 = vector.broadcast %126 : vector<1x128xf32> to vector<8x128xf32>
    %128 = arith.addf %125, %127 : vector<8x128xf32>
    %129 = arith.truncf %128 : vector<8x128xf32> to vector<8x128xbf16>
    %c0_52 = arith.constant 0 : index
    %c0_53 = arith.constant 0 : index
    %130 = vector.load %arg15[%c0_52, %c0_53] : memref<128x128xbf16, #tpu.memory_space<vmem>>, vector<128x128xbf16>
    %cst_54 = arith.constant dense<0.000000e+00> : vector<8x128xf32>
    %131 = tpu.matmul %129, %130, %cst_54 {dimension_numbers = #tpu.dot_dimension_numbers<[1], [0], [0], [1], [0, 0, 1, 1], [], []>} : vector<8x128xbf16>, vector<128x128xbf16>, vector<8x128xf32> -> vector<8x128xf32>
    %c0_55 = arith.constant 0 : index
    %c0_56 = arith.constant 0 : index
    %132 = vector.load %arg16[%c0_55, %c0_56] : memref<1x128xf32, #tpu.memory_space<vmem>>, vector<1x128xf32>
    %133 = vector.broadcast %132 : vector<1x128xf32> to vector<8x128xf32>
    %134 = arith.addf %131, %133 : vector<8x128xf32>
    %135 = math.tanh %134 : vector<8x128xf32>
    %c0_57 = arith.constant 0 : index
    %c0_58 = arith.constant 0 : index
    %136 = vector.load %arg17[%c0_57, %c0_58] : memref<1x128xf32, #tpu.memory_space<vmem>>, vector<1x128xf32>
    %137 = vector.broadcast %136 : vector<1x128xf32> to vector<8x128xf32>
    %138 = arith.mulf %135, %137 : vector<8x128xf32>
    %cst_59 = arith.constant dense<0.000000e+00> : vector<8xf32>
    %139 = vector.multi_reduction <add>, %138, %cst_59 [1] : vector<8x128xf32> to vector<8xf32>
    %140 = vector.shape_cast %139 : vector<8xf32> to vector<8x1xf32>
    %c0_60 = arith.constant 0 : index
    %c0_61 = arith.constant 0 : index
    %141 = vector.load %arg18[%c0_60, %c0_61] : memref<1x1xf32, #tpu.memory_space<vmem>>, vector<1x1xf32>
    %142 = vector.broadcast %141 : vector<1x1xf32> to vector<8x1xf32>
    %143 = arith.addf %140, %142 : vector<8x1xf32>
    %144 = vector.shape_cast %143 : vector<8x1xf32> to vector<8x1xf32>
    %145 = vector.broadcast %144 : vector<8x1xf32> to vector<8x128xf32>
    %c0_62 = arith.constant 0 : index
    %c0_63 = arith.constant 0 : index
    %146 = vector.load %arg19[%c0_62, %c0_63] : memref<8x128xf32, #tpu.memory_space<vmem>>, vector<8x128xf32>
    tpu.vector_store %arg19[%c0_62, %c0_63], %145 {strides = array<i32>} : memref<8x128xf32, #tpu.memory_space<vmem>>, vector<8x128xf32>,
    return
  }
  func.func @transform_0(%arg0: i32) -> (i32, i32) {
    %c0_i32 = arith.constant 0 : i32
    %c0_i32_0 = arith.constant 0 : i32
    return %arg0, %c0_i32 : i32, i32
  }
  func.func @transform_1(%arg0: i32) -> (i32, i32, i32) {
    %c0_i32 = arith.constant 0 : i32
    %c0_i32_0 = arith.constant 0 : i32
    %c0_i32_1 = arith.constant 0 : i32
    return %arg0, %c0_i32, %c0_i32_0 : i32, i32, i32
  }
  func.func @transform_2(%arg0: i32) -> (i32, i32) {
    %c0_i32 = arith.constant 0 : i32
    %c0_i32_0 = arith.constant 0 : i32
    %c0_i32_1 = arith.constant 0 : i32
    return %c0_i32, %c0_i32_0 : i32, i32
  }
  func.func @transform_3(%arg0: i32) -> (i32, i32) {
    %c0_i32 = arith.constant 0 : i32
    %c0_i32_0 = arith.constant 0 : i32
    %c0_i32_1 = arith.constant 0 : i32
    return %c0_i32, %c0_i32_0 : i32, i32
  }
  func.func @transform_4(%arg0: i32) -> (i32, i32) {
    %c0_i32 = arith.constant 0 : i32
    %c0_i32_0 = arith.constant 0 : i32
    %c0_i32_1 = arith.constant 0 : i32
    return %c0_i32, %c0_i32_0 : i32, i32
  }
  func.func @transform_5(%arg0: i32) -> (i32, i32) {
    %c0_i32 = arith.constant 0 : i32
    %c0_i32_0 = arith.constant 0 : i32
    %c0_i32_1 = arith.constant 0 : i32
    return %c0_i32, %c0_i32_0 : i32, i32
  }
  func.func @transform_6(%arg0: i32) -> (i32, i32) {
    %c0_i32 = arith.constant 0 : i32
    %c0_i32_0 = arith.constant 0 : i32
    %c0_i32_1 = arith.constant 0 : i32
    return %c0_i32, %c0_i32_0 : i32, i32
  }
  func.func @transform_7(%arg0: i32) -> (i32, i32) {
    %c0_i32 = arith.constant 0 : i32
    %c0_i32_0 = arith.constant 0 : i32
    %c0_i32_1 = arith.constant 0 : i32
    return %c0_i32, %c0_i32_0 : i32, i32
  }
  func.func @transform_8(%arg0: i32) -> (i32, i32) {
    %c0_i32 = arith.constant 0 : i32
    %c0_i32_0 = arith.constant 0 : i32
    %c0_i32_1 = arith.constant 0 : i32
    return %c0_i32, %c0_i32_0 : i32, i32
  }
  func.func @transform_9(%arg0: i32) -> (i32, i32) {
    %c0_i32 = arith.constant 0 : i32
    %c0_i32_0 = arith.constant 0 : i32
    %c0_i32_1 = arith.constant 0 : i32
    return %c0_i32, %c0_i32_0 : i32, i32
  }
  func.func @transform_10(%arg0: i32) -> (i32, i32) {
    %c0_i32 = arith.constant 0 : i32
    %c0_i32_0 = arith.constant 0 : i32
    %c0_i32_1 = arith.constant 0 : i32
    return %c0_i32, %c0_i32_0 : i32, i32
  }
  func.func @transform_11(%arg0: i32) -> (i32, i32) {
    %c0_i32 = arith.constant 0 : i32
    %c0_i32_0 = arith.constant 0 : i32
    %c0_i32_1 = arith.constant 0 : i32
    return %c0_i32, %c0_i32_0 : i32, i32
  }
  func.func @transform_12(%arg0: i32) -> (i32, i32) {
    %c0_i32 = arith.constant 0 : i32
    %c0_i32_0 = arith.constant 0 : i32
    %c0_i32_1 = arith.constant 0 : i32
    return %c0_i32, %c0_i32_0 : i32, i32
  }
  func.func @transform_13(%arg0: i32) -> (i32, i32) {
    %c0_i32 = arith.constant 0 : i32
    %c0_i32_0 = arith.constant 0 : i32
    %c0_i32_1 = arith.constant 0 : i32
    return %c0_i32, %c0_i32_0 : i32, i32
  }
  func.func @transform_14(%arg0: i32) -> (i32, i32) {
    %c0_i32 = arith.constant 0 : i32
    %c0_i32_0 = arith.constant 0 : i32
    %c0_i32_1 = arith.constant 0 : i32
    return %c0_i32, %c0_i32_0 : i32, i32
  }
  func.func @transform_15(%arg0: i32) -> (i32, i32) {
    %c0_i32 = arith.constant 0 : i32
    %c0_i32_0 = arith.constant 0 : i32
    %c0_i32_1 = arith.constant 0 : i32
    return %c0_i32, %c0_i32_0 : i32, i32
  }
  func.func @transform_16(%arg0: i32) -> (i32, i32) {
    %c0_i32 = arith.constant 0 : i32
    %c0_i32_0 = arith.constant 0 : i32
    %c0_i32_1 = arith.constant 0 : i32
    return %c0_i32, %c0_i32_0 : i32, i32
  }
  func.func @transform_17(%arg0: i32) -> (i32, i32) {
    %c0_i32 = arith.constant 0 : i32
    %c0_i32_0 = arith.constant 0 : i32
    %c0_i32_1 = arith.constant 0 : i32
    return %c0_i32, %c0_i32_0 : i32, i32
  }
  func.func @transform_18(%arg0: i32) -> (i32, i32) {
    %c0_i32 = arith.constant 0 : i32
    %c0_i32_0 = arith.constant 0 : i32
    return %arg0, %c0_i32 : i32, i32
  }
}

</mosaic_0001>

<bundles_post_ra>
// kernel: tpu_custom_call.1
= control target key start
LH: loop header
LB: loop body
LE: loop exit
PB: predicated region body
PF: predicated region fallthrough
CT: control target
= control target key end

     0   :  { %s4055_s0 = inlined_call_operand.vmem [shape: s32[128,1], index: 0, kind: input, shape index: {}]   ;;  %s4056_s1 = inlined_call_operand.vmem [shape: f32[16,1,8], index: 1, kind: input, shape index: {}]   ;;  %s4057_s2 = inlined_call_operand.vmem [shape: f32[8,128], index: 2, kind: input, shape index: {}]   ;;  %s4058_s3 = inlined_call_operand.hbm [shape: bf16[64,128], index: 3, kind: input, shape index: {}]   ;;  %s4059_s4 = inlined_call_operand.hbm [shape: bf16[128,384], index: 4, kind: input, shape index: {}]   ;;  %s4060_s5 = inlined_call_operand.hbm [shape: bf16[128,128], index: 5, kind: input, shape index: {}]   ;;  %s4061_s6 = inlined_call_operand.vmem [shape: f32[1,128], index: 6, kind: input, shape index: {}]   ;;  %s4062_s7 = inlined_call_operand.vmem [shape: f32[1,128], index: 7, kind: input, shape index: {}]   ;;  %s4063_s8 = inlined_call_operand.vmem [shape: bf16[128,256], index: 8, kind: input, shape index: {}]   ;;  %s4064_s9 = inlined_call_operand.vmem [shape: f32[1,256], index: 9, kind: input, shape index: {}]   ;;  %s4065_s10 = inlined_call_operand.hbm [shape: bf16[256,128], index: 10, kind: input, shape index: {}]   ;;  %s4066_s11 = inlined_call_operand.vmem [shape: f32[1,128], index: 11, kind: input, shape index: {}]   ;;  %s4067_s12 = inlined_call_operand.vmem [shape: f32[1,128], index: 12, kind: input, shape index: {}]   ;;  %s4068_s13 = inlined_call_operand.vmem [shape: f32[1,128], index: 13, kind: input, shape index: {}]   ;;  %s4069_s14 = inlined_call_operand.hbm [shape: bf16[128,128], index: 14, kind: input, shape index: {}]   ;;  %s4070_s15 = inlined_call_operand.vmem [shape: f32[1,128], index: 15, kind: input, shape index: {}]   ;;  %s4071_s16 = inlined_call_operand.vmem [shape: f32[1,128], index: 16, kind: input, shape index: {}]   ;;  %s4072_s17 = inlined_call_operand.<no memory space> [shape: f32[1,1], index: 17, kind: input, shape index: {}]   ;;  %s4073_s18 = inlined_call_operand.hbm [shape: f32[16,128], index: 18, kind: output, shape index: {}]  }
   0x1   :  { %4083 = sst [smem:[#allocation24_spill]] %s4055_s0  ;;  %v23_v0 = vstv %s4072_s17 }
   0x2   :  { %4084 = sst [smem:[#allocation25_spill]] %s4056_s1  ;;  %24 = vst [vmem:[#allocation2] sm:$0x1] %v23_v0 }
   0x3   :  { %4085 = sst [smem:[#allocation26_spill]] %s4057_s2 }
   0x4   :  { %4086 = sst [smem:[#allocation27_spill]] %s4059_s4 }
   0x5   :  { %4087 = sst [smem:[#allocation28_spill]] %s4065_s10 }
   0x6   :  { %4088 = sst [smem:[#allocation29_spill]] %s4073_s18 }
   0x7   :  { %25 = vsyncpa [#allocation4], 0 }
   0x8   :  { %26 = vsyncpa [#allocation7], 0 }
   0x9   :  { %27 = vsyncpa [#allocation10], 0 }
   0xa   :  { %28 = vsyncpa [#allocation5], 0 }
   0xb   :  { %30 = vsyncpa [#allocation5 + $0x1], 0  ;;  %s3506_s29 = smov 0   ;;  %s3508_s30 = smov 0  }
   0xc   :  { %s3510_s0 = smov 0   ;;  %s3512_s19 = smov 0  }
   0xd LB: > { %4089 = sst [smem:[#allocation17_spill]] %s3382_s29  ;;  %s3527_s17 = sadd.s32 4294967295, %s3394_s19   ;;  %s3394_s19 = sphi %s3512_s19, %s4110_s19   ;;  %s3390_s0 = sphi %s3510_s0, %s4112_s0   ;;  %s3386_s30 = sphi %s3508_s30, %s4114_s30   ;;  %s3382_s29 = sphi %s3506_s29, %s4113_s29  }
   0xe   : > { %4090 = sst [smem:[#allocation18_spill]] %s3390_s0  ;;  %s2588_s1 = sadd.s32 4294967294, %s3394_s19  }
   0xf   : > { %4091 = sst [smem:[#allocation19_spill]] %s3394_s19  ;;  %s3531_s20 = sadd.s32 1, %s3394_s19  }
  0x10   : > { %4092 = sst [smem:[#allocation20_spill]] %s3531_s20  ;;  %s431_s21 = sadd.s32 1, %s3390_s0 }
  0x11   : > { %s428_s22 = ssub.s32 %s3394_s19, %s3531_s20  ;;  %p441_p0 = scmp.ne.s32.totalorder %s3390_s0, %s3386_s30 }
  0x12   : > { %p429_p1 = scmp.eq.s32.totalorder %s428_s22, 0  ;;  %p442_p2 = scmp.eq.s32.totalorder %s3527_s17, 1 }
  0x13   : > { %p447_p3 = scmp.ne.s32.totalorder %s3386_s30, %s3382_s29  ;;  %p448_p4 = scmp.eq.s32.totalorder %s2588_s1, 1 }
  0x14   : > { %s3542_s2 = scalar_select %p429_p1, %s3390_s0, %s431_s21  }
  0x15   : > { %p3544_p5 = por %p442_p2, %p441_p0  ;;  %p3548_p6 = por %p448_p4, %p447_p3 }
  0x16   : > { %4093 = sst [smem:[#allocation21_spill]] %s3542_s2  ;;  %p2589_p7 = scmp.ge.s32.totalorder %s3394_s19, 1 }
  0x17   : > { %s4094_s23 = scalar_select %p3544_p5, 1, 0 }
  0x18   : > { %s4096_s24 = scalar_select %p3548_p6, 1, 0 }
  0x19   : > { %4095 = sst [smem:[#allocation22_spill]] %s4094_s23  ;;  %p455_p8 = scmp.lt.s32.totalorder %s3394_s19, 3 }
  0x1a   : > { %4097 = sst [smem:[#allocation23_spill]] %s4096_s24  ;;  %p3060_p9 = scmp.eq.s32.totalorder %s3527_s17, 0 }
  0x1b   : > { %p3555_p10 = pnand %p2589_p7, %p455_p8  ;;  %s4099_s4 = sld [smem:[#allocation27_spill]] }
  0x1c   : > { %s3396_s1 = smov [#allocation6]   ;;  %s4101_s10 = sld [smem:[#allocation28_spill]] }
  0x1d   : > { %p3040_p11 = pneg %p3555_p10  ;;  %s485_s21 = sshll.u32 %s3396_s1, 4  ;;  %s486_s21 = int_to_ptr.vmem [resolvable:$true] %s485_s21 }
  0x1e   : > { %s3397_s26 = smov 192   ;;  %s3398_s27 = smov 12  }
  0x1f   : > { %p3566_p12 = pnand %p3060_p9, %p3040_p11  ;;  %s469_s19 = sshll.u32 %s4058_s3, 4  ;;  %s470_s19 = int_to_ptr.hbm [resolvable:$true] %s469_s19 }
  0x20   : > { %s3400_s18 = smov 64   ;;  %s3401_s0 = smov 4  }
  0x21   : > { %s483_s28 = sshll.u32 %s4099_s4, 4  ;;  %s3399_s4 = smov [#allocation9]   ;;  %s484_s28 = int_to_ptr.hbm [resolvable:$true] %s483_s28 }
  0x22   : > { %s523_s20 = sshll.u32 %s4101_s10, 4  ;;  %s525_s1 = sshll.u32 %s3399_s4, 4  ;;  %s524_s20 = int_to_ptr.hbm [resolvable:$true] %s523_s20  ;;  %s526_s1 = int_to_ptr.vmem [resolvable:$true] %s525_s1 }
  0x23   : > { %3046 = dma.hbm_to_vmem [thread:$0]  (!%p3566_p12), %s484_s28, 3072, %s486_s21, [#allocation7], %s3397_s26, %s3397_s26, %s3398_s27  }
  0x24   : > { %3052 = dma.hbm_to_vmem [thread:$0]  (!%p3566_p12), %s524_s20, 2048, %s526_s1, [#allocation10], %s3400_s18, %s3400_s18, %s3401_s0  }
  0x25   : > { %s497_s23 = sshll.u32 %s4060_s5, 4  ;;  %s3402_s28 = smov [#allocation3]   ;;  %s498_s23 = int_to_ptr.hbm [resolvable:$true] %s497_s23 }
  0x26   : > { %s471_s21 = sshll.u32 %s3402_s28, 4  ;;  %s3403_s4 = smov [#allocation8]   ;;  %s472_s21 = int_to_ptr.vmem [resolvable:$true] %s471_s21 }
  0x27   : > { %3043 = dma.hbm_to_vmem [thread:$0]  (!%p3566_p12), %s470_s19, 512, %s472_s21, [#allocation4], %s3400_s18, %s3400_s18, %s3401_s0  }
  0x28   : > { %s499_s29 = sshll.u32 %s3403_s4, 4  ;;  %s546_s27 = sshll.u32 %s4069_s14, 4  ;;  %s500_s29 = int_to_ptr.vmem [resolvable:$true] %s499_s29  ;;  %s547_s27 = int_to_ptr.hbm [resolvable:$true] %s546_s27 }
  0x29   : > { %3049 = dma.hbm_to_vmem [thread:$0]  (!%p3566_p12), %s498_s23, 1024, %s500_s29, [#allocation7], %s3400_s18, %s3400_s18, %s3401_s0  }
  0x2a   : > { %s3404_s20 = smov [#allocation11]   ;;  %590 = sbr.rel (%p3555_p10) target bundleno = 2461 (0x99d), region = 92 }
  0x2b   : > { %s548_s10 = sshll.u32 %s3404_s20, 4  ;;  %s549_s10 = int_to_ptr.vmem [resolvable:$true] %s548_s10 }
  0x2c   : > { %3055 = dma.hbm_to_vmem [thread:$0]  (!%p3566_p12), %s547_s27, 1024, %s549_s10, [#allocation10], %s3400_s18, %s3400_s18, %s3401_s0  }
  0x2f   : > { %3365 = dma.done.wait (%p3060_p9), [#allocation4], 512  }
  0x30   : > { %3367 = vsyncadd (%p3060_p9), [#allocation4], 4294966784 }
  0x31   : > { %3369 = dma.done.wait (%p3060_p9), [#allocation7], 4096  }
  0x32   : > { %3371 = vsyncadd (%p3060_p9), [#allocation7], 4294963200 }
  0x33   : > { %3373 = dma.done.wait (%p3060_p9), [#allocation10], 3072  }
  0x34   : > { %3375 = vsyncadd (%p3060_p9), [#allocation10], 4294964224  ;;  %s3607_s18 = sshll.u32 %s3527_s17, 3  ;;  %v3405_v1 = vmov 0   ;;  %s4102_s1 = sld [smem:[#allocation24_spill]]  ;;  %v2945_v5 = vld [vmem:[#allocation3 + $0x18] sm:$0xff]  ;;  %v689_v14 = vlaneseq }
  0x35   : > { %3116 = vset.pattern.permute.xlu1 %v3405_v1  ;;  %3115 = vset.pattern.permute.xlu0 %v3405_v1  ;;  %p670_p13 = scmp.lt.s32.totalorder %s3607_s18, 15  ;;  %v2944_v11 = vld [vmem:[#allocation3 + $0x10] sm:$0xff]  ;;  %v2943_v12 = vld [vmem:[#allocation3 + $0x8] sm:$0xff]  ;;  %v2942_v13 = vld [vmem:[#allocation3] sm:$0xff]  ;;  %v3406_v19 = vmov 0.0   ;;  %vm775_vm2 = vcmask 523264  }
  0x36   : > { %3117 = vset.pattern.permute.xlu2 %v3405_v1  ;;  %792 = vmatpush.bf16.msra.mxu0 %v2945_v5  ;;  %v3617_v16 = vand.u32 127, %v689_v14  ;;  %v2720_v28 = vld [vmem:[#allocation6 + $0xa8] sm:$0xf]  ;;  %v2968_v29 = vld [vmem:[#allocation6 + $0xb0] sm:$0xf0]  ;;  %s4103_s28 = sld [smem:[#allocation26_spill]] }
  0x37   : > { %s3611_s19 = scalar_select %p670_p13, %s3607_s18, 15  ;;  %v2967_v30 = vld [vmem:[#allocation6 + $0xac] sm:$0xf]  ;;  %v2721_v31 = vor.u32 %v2968_v29, %v2720_v28  ;;  %v2722_v32 = vld [vmem:[#allocation6 + $0xb4] sm:$0xf0]  ;;  %vm1353_vm9 = vcmask 1043456  }
  0x38   : > { %v2728_v33 = vld [vmem:[#allocation6 + $0xb0] sm:$0xf]  ;;  %v2969_v34 = vld [vmem:[#allocation6 + $0xb8] sm:$0xf0]  ;;  %v2725_v35 = vor.u32 %v2967_v30, %v2722_v32  ;;  %v2964_v39 = vld [vmem:[#allocation6 + $0x94] sm:$0xf] }
  0x39   : > { %s2604_s23 = sshll.u32 %s3611_s19, 3  ;;  %v2729_v36 = vor.u32 %v2969_v34, %v2728_v33  ;;  %v2708_v37 = vld [vmem:[#allocation6 + $0x90] sm:$0xf]  ;;  %v2965_v38 = vld [vmem:[#allocation6 + $0x98] sm:$0xf0]  ;;  %990 = vmatpush.bf16.msra.mxu1 %v2721_v31  ;;  %s4104_s29 = sld [smem:[#allocation25_spill]] }
  0x3a   : > { %s673_s0 = scalar_lea.vmem %s4102_s1, %s2604_s23  ;;  %793 = vmatpush.bf16.msra.mxu0 %v2944_v11  ;;  %v2709_v40 = vor.u32 %v2965_v38, %v2708_v37  ;;  %v2710_v41 = vld [vmem:[#allocation6 + $0x9c] sm:$0xf0]  ;;  %v2716_v42 = vld [vmem:[#allocation6 + $0x98] sm:$0xf]  ;;  %v2966_v43 = vld [vmem:[#allocation6 + $0xa0] sm:$0xf0]  ;;  %1019 = vmatpush.bf16.msra.mxu2 %v2725_v35 }
  0x3b   : > { %v683_v2 = vld [vmem:[%s673_s0 + $0x10] sm:$0xff]  ;;  %v681_v3 = vld [vmem:[%s673_s0] sm:$0xff]  ;;  %v684_v6 = vld [vmem:[%s673_s0 + $0x18] sm:$0xff]  ;;  %1048 = vmatpush.bf16.msra.mxu3 %v2729_v36  ;;  %v2713_v44 = vor.u32 %v2964_v39, %v2710_v41  ;;  %v2717_v45 = vor.u32 %v2966_v43, %v2716_v42  ;;  %vm1253_vm10 = vcmask 64512   ;;  %vm1544_vm11 = vcmask 1041409   ;;  %s666_s21 = sand.u32 1, %s3386_s30  }
  0x3c   : > { %698 = vperm.xlu1 %3116, %v683_v2   ;;  %692 = vperm.xlu0 %3115, %v681_v3   ;;  %v685_v4 = vld [vmem:[%s673_s0 + $0x20] sm:$0xff]  ;;  %v682_v7 = vld [vmem:[%s673_s0 + $0x8] sm:$0xff]  ;;  %v688_v9 = vld [vmem:[%s673_s0 + $0x38] sm:$0xff]  ;;  %vm1547_vm12 = vcmask 1042434   ;;  %vm1550_vm13 = vcmask 1043459   ;;  %vm1553_vm14 = vcmask 1044484  }
  0x3d   : > { %704 = vperm.xlu2 %3117, %v685_v4   ;;  %v686_v8 = vld [vmem:[%s673_s0 + $0x28] sm:$0xff]  ;;  %v687_v10 = vld [vmem:[%s673_s0 + $0x30] sm:$0xff]  ;;  %v2696_v46 = vld [vmem:[#allocation6 + $0x78] sm:$0xf]  ;;  %991 = vmatpush.bf16.msra.mxu1 %v2709_v40  ;;  %vm1556_vm15 = vcmask 1045509   ;;  %s2602_s4 = sshll.u32 %s666_s21, 3 }
  0x3e   : > { %794 = vmatpush.bf16.msra.mxu0 %v2943_v12  ;;  %v2962_v47 = vld [vmem:[#allocation6 + $0x80] sm:$0xf0]  ;;  %v2961_v48 = vld [vmem:[#allocation6 + $0x7c] sm:$0xf]  ;;  %v2698_v50 = vld [vmem:[#allocation6 + $0x84] sm:$0xf0]  ;;  %1020 = vmatpush.bf16.msra.mxu2 %v2713_v44 }
  0x3f   : > { %v2704_v51 = vld [vmem:[#allocation6 + $0x80] sm:$0xf]  ;;  %v2963_v52 = vld [vmem:[#allocation6 + $0x88] sm:$0xf0]  ;;  %v2697_v53 = vor.u32 %v2962_v47, %v2696_v46  ;;  %1049 = vmatpush.bf16.msra.mxu3 %v2717_v45  ;;  %v2701_v54 = vor.u32 %v2961_v48, %v2698_v50  ;;  %v2958_v58 = vld [vmem:[#allocation6 + $0x64] sm:$0xf]  ;;  %s3678_s24 = scalar_lea.vmem %s4104_s29, %s3611_s19 }
  0x40   : > { %v2705_v55 = vor.u32 %v2963_v52, %v2704_v51  ;;  %v2684_v56 = vld [vmem:[#allocation6 + $0x60] sm:$0xf]  ;;  %v2959_v57 = vld [vmem:[#allocation6 + $0x68] sm:$0xf0]  ;;  %v2686_v59 = vld [vmem:[#allocation6 + $0x6c] sm:$0xf0] }
  0x41   : > { %v2692_v60 = vld [vmem:[#allocation6 + $0x68] sm:$0xf]  ;;  %v2960_v61 = vld [vmem:[#allocation6 + $0x70] sm:$0xf0]  ;;  %992 = vmatpush.bf16.msra.mxu1 %v2697_v53  ;;  %v2685_v0 = vor.u32 %v2959_v57, %v2684_v56  ;;  %v2689_v1 = vor.u32 %v2958_v58, %v2686_v59  ;;  %v2955_v5 = vld [vmem:[#allocation6 + $0x4c] sm:$0xf] }
  0x42   : > { %795 = vmatpush.bf16.msra.mxu0 %v2942_v13  ;;  %1021 = vmatpush.bf16.msra.mxu2 %v2701_v54  ;;  %v2672_v2 = vld [vmem:[#allocation6 + $0x48] sm:$0xf]  ;;  %v2956_v3 = vld [vmem:[#allocation6 + $0x50] sm:$0xf0]  ;;  %v2693_v4 = vor.u32 %v2960_v61, %v2692_v60  ;;  %v2648_v28 = vld [vmem:[#allocation6 + $0x18] sm:$0xf] }
  0x43   : > { %1050 = vmatpush.bf16.msra.mxu3 %v2705_v55  ;;  %v2950_v29 = vld [vmem:[#allocation6 + $0x20] sm:$0xf0]  ;;  %v2949_v31 = vld [vmem:[#allocation6 + $0x1c] sm:$0xf]  ;;  %v2650_v32 = vld [vmem:[#allocation6 + $0x24] sm:$0xf0] }
  0x44   : > { %701 = vperm.xlu1 %3116, %v684_v6   ;;  %695 = vperm.xlu0 %3115, %v682_v7   ;;  %v2674_v6 = vld [vmem:[#allocation6 + $0x54] sm:$0xf0]  ;;  %v2656_v33 = vld [vmem:[#allocation6 + $0x20] sm:$0xf]  ;;  %v2951_v34 = vld [vmem:[#allocation6 + $0x28] sm:$0xf0] }
  0x45   : > { %707 = vperm.xlu2 %3117, %v686_v8   ;;  %v2680_v8 = vld [vmem:[#allocation6 + $0x50] sm:$0xf]  ;;  %993 = vmatpush.bf16.msra.mxu1 %v2685_v0  ;;  %v2677_v11 = vor.u32 %v2955_v5, %v2674_v6  ;;  %v2657_v35 = vor.u32 %v2951_v34, %v2656_v33  ;;  %v2636_v36 = vld [vmem:[#allocation6] sm:$0xf]  ;;  %v2947_v37 = vld [vmem:[#allocation6 + $0x8] sm:$0xf0] }
  0x46   : > { %1022 = vmatpush.bf16.msra.mxu2 %v2689_v1  ;;  %v2946_v38 = vld [vmem:[#allocation6 + $0x4] sm:$0xf]  ;;  %v2637_v39 = vor.u32 %v2947_v37, %v2636_v36  ;;  %v2638_v40 = vld [vmem:[#allocation6 + $0xc] sm:$0xf0]  ;;  %v2644_v41 = vld [vmem:[#allocation6 + $0x8] sm:$0xf] }
  0x47   : > { %1051 = vmatpush.bf16.msra.mxu3 %v2693_v4  ;;  %v2948_v42 = vld [vmem:[#allocation6 + $0x10] sm:$0xf0]  ;;  %v2641_v43 = vor.u32 %v2946_v38, %v2638_v40  ;;  %v817_v46 = vld [vmem:[%s4103_s28] sm:$0xff]  ;;  %s4106_s26 = sld [smem:[#allocation29_spill]]  ;;  %s668_s20 = scalar_lea.vmem [#allocation12], %s2602_s4 }
  0x48   : > { %v2645_v44 = vor.u32 %v2948_v42, %v2644_v41  ;;  %s2467_s10 = sshll.u32 %s668_s20, 4  ;;  %s2455_s23 = scalar_lea.sflag [#allocation5], %s666_s21  ;;  %s2468_s10 = int_to_ptr.vmem [resolvable:$true] %s2467_s10 }
  0x4a   : > { %1023 = vmatpush.bf16.msra.mxu2 %v2677_v11 }
  0x4c   : > { %713 = vperm.xlu1 %3116, %v688_v9   ;;  %710 = vperm.xlu0 %3115, %v687_v10   ;;  %v2957_v9 = vld [vmem:[#allocation6 + $0x58] sm:$0xf0]  ;;  %v2673_v10 = vor.u32 %v2956_v3, %v2672_v2 }
  0x4d   : > { %v2681_v12 = vor.u32 %v2957_v9, %v2680_v8  ;;  %s2465_s27 = scalar_lea.hbm %s4106_s26, %s3607_s18  ;;  %s3340_s17 = scalar_lea.hbm %s4106_s26, 16 }
  0x4e   : > { %994 = vmatpush.bf16.msra.mxu1 %v2673_v10  ;;  %s2469_s19 = sshll.u32 %s2465_s27, 4  ;;  %s2470_s19 = int_to_ptr.hbm [resolvable:$true] %s2469_s19 }
  0x4f   : > { %1052 = vmatpush.bf16.msra.mxu3 %v2681_v12  ;;  %s3334_s25 = sshra.s32 %s2470_s19, 4  ;;  %s3335_s25 = int_to_ptr.hbm [resolvable:$true] %s3334_s25 }
  0x50   : > { %s3336_s22 = scalar_lea.hbm %s3335_s25, 8  ;;  %p3341_p3 = scmp.lt.s32.totalorder %s3335_s25, %s4106_s26 }
  0x51   : > { %p3337_p0 = scmp.ne.s32.totalorder %s3335_s25, %s3336_s22  ;;  %p3342_p4 = scmp.lt.s32.totalorder %s3340_s17, %s3336_s22 }
  0x53   : > { %p3338_p1 = pnand %p3337_p0, %p3544_p5  ;;  %p3343_p7 = por %p3342_p4, %p3341_p3 }
  0x55   : > { %p3339_p2 = pneg %p3338_p1 }
  0x57   : > { %p3344_p8 = pnand %p3343_p7, %p3339_p2 }
  0x97   : > { %v705_v26 = vpop.permute.xlu2 %704 }
  0x98   : > { %vm719_vm5 = vcmp.eq.s32.totalorder %v705_v26, %v3617_v16 }
  0x99   : > { %v2610_v62 = vsel %vm719_vm5, 1.0, %v3406_v19 }
  0x9f   : > { %v708_v49 = vpop.permute.xlu2 %707 }
  0xa0   : > { %vm720_vm6 = vcmp.eq.s32.totalorder %v708_v49, %v3617_v16 }
  0xa1   : > { %v2611_v63 = vsel %vm720_vm6, 1.0, %v3406_v19 }
  0xa2   : > { %v741_v7 = vpack.c.bf16 %v2611_v63, %v2610_v62 }
  0xae   : > { %v693_v15 = vpop.permute.xlu0 %692  ;;  %v699_v18 = vpop.permute.xlu1 %698 }
  0xaf   : > { %vm715_vm0 = vcmp.eq.s32.totalorder %v693_v15, %v3617_v16  ;;  %vm717_vm3 = vcmp.eq.s32.totalorder %v699_v18, %v3617_v16 }
  0xb0   : > { %v2606_v20 = vsel %vm715_vm0, 1.0, %v3406_v19  ;;  %v2608_v24 = vsel %vm717_vm3, 1.0, %v3406_v19  ;;  %vm1559_vm0 = vcmask 1046534  }
  0xb6   : > { %v696_v17 = vpop.permute.xlu0 %695  ;;  %v702_v23 = vpop.permute.xlu1 %701 }
  0xb7   : > { %vm716_vm1 = vcmp.eq.s32.totalorder %v696_v17, %v3617_v16  ;;  %vm718_vm4 = vcmp.eq.s32.totalorder %v702_v23, %v3617_v16 }
  0xb8   : > { %v2607_v21 = vsel %vm716_vm1, 1.0, %v3406_v19  ;;  %v2609_v25 = vsel %vm718_vm4, 1.0, %v3406_v19  ;;  %vm1562_vm1 = vcmask 1047559  }
  0xb9   : > { %v739_v22 = vpack.c.bf16 %v2607_v21, %v2606_v20  ;;  %v740_v27 = vpack.c.bf16 %v2609_v25, %v2608_v24  ;;  %v2660_v20 = vld [vmem:[#allocation6 + $0x30] sm:$0xf]  ;;  %v2953_v21 = vld [vmem:[#allocation6 + $0x38] sm:$0xf0]  ;;  %v2662_v24 = vld [vmem:[#allocation6 + $0x3c] sm:$0xf0] }
  0xba   : > { %v2661_v23 = vor.u32 %v2953_v21, %v2660_v20  ;;  %v2668_v25 = vld [vmem:[#allocation6 + $0x38] sm:$0xf] }
  0xbb   : > { %2630 = vmatmul.msk.bf16.vlgmr.msra.gmra.mxu0 %vm775_vm2, %v739_v22  ;;  %v2952_v22 = vld [vmem:[#allocation6 + $0x34] sm:$0xf] }
  0xbc   : > { %v2665_v26 = vor.u32 %v2952_v22, %v2662_v24  ;;  %995 = vmatpush.bf16.msra.mxu1 %v2661_v23 }
  0xbe   : > { %v714_v13 = vpop.permute.xlu1 %713  ;;  %v711_v14 = vpop.permute.xlu0 %710  ;;  %1024 = vmatpush.bf16.msra.mxu2 %v2665_v26 }
  0xbf   : > { %vm722_vm7 = vcmp.eq.s32.totalorder %v714_v13, %v3617_v16  ;;  %vm721_vm8 = vcmp.eq.s32.totalorder %v711_v14, %v3617_v16  ;;  %v2649_v16 = vor.u32 %v2950_v29, %v2648_v28 }
  0xc0   : > { %v2613_v15 = vsel %vm722_vm7, 1.0, %v3406_v19  ;;  %v2612_v17 = vsel %vm721_vm8, 1.0, %v3406_v19  ;;  %v2653_v19 = vor.u32 %v2949_v31, %v2650_v32 }
  0xc1   : > { %v742_v18 = vpack.c.bf16 %v2613_v15, %v2612_v17  ;;  %996 = vmatpush.bf16.msra.mxu1 %v2649_v16 }
  0xc2   : > { %1025 = vmatpush.bf16.msra.mxu2 %v2653_v19 }
  0xc5   : > { %997 = vmatpush.bf16.msra.mxu1 %v2637_v39 }
  0xc6   : > { %1026 = vmatpush.bf16.msra.mxu2 %v2641_v43 }
  0xcb   : > { %2631 = vmatmul.msk.bf16.gmra.mxu0 %vm775_vm2, %v740_v27  ;;  %v2954_v27 = vld [vmem:[#allocation6 + $0x40] sm:$0xf0] }
  0xcc   : > { %v2669_v30 = vor.u32 %v2954_v27, %v2668_v25 }
  0xce   : > { %1053 = vmatpush.bf16.msra.mxu3 %v2669_v30 }
  0xd2   : > { %1054 = vmatpush.bf16.msra.mxu3 %v2657_v35 }
  0xd6   : > { %1055 = vmatpush.bf16.msra.mxu3 %v2645_v44 }
  0xdb   : > { %2632 = vmatmul.msk.bf16.gmra.mxu0 %vm775_vm2, %v741_v7 }
  0xeb   : > { %2633 = vmatmul.msk.bf16.gmra.mxu0 %vm775_vm2, %v742_v18 }
 0x138   : > { %v797_v45 = vpop.f32.mrf.mxu0 }
 0x139   : > { %v3642_v48 = vadd.f32 %v817_v46, %v797_v45 }
 0x140   : > { %v799_v47 = vpop.f32.mrf.mxu0 }
 0x141   : > { %v3644_v49 = vadd.f32 %v817_v46, %v799_v47 }
 0x143   : > { %v826_v50 = vpack.c.bf16 %v3644_v49, %v3642_v48 }
 0x145   : > { %998 = vmatmul.bf16.vlgmr.msra.gmra.mxu1 %v826_v50  ;;  %1027 = vmatmul.bf16.vlgmr.msra.gmra.mxu2 %v826_v50 }
 0x146   : > { %1056 = vmatmul.bf16.vlgmr.msra.gmra.mxu3 %v826_v50 }
 0x148   : > { %v802_v51 = vpop.f32.mrf.mxu0 }
 0x149   : > { %v3648_v53 = vadd.f32 %v817_v46, %v802_v51 }
 0x150   : > { %v804_v52 = vpop.f32.mrf.mxu0 }
 0x151   : > { %v3650_v54 = vadd.f32 %v817_v46, %v804_v52 }
 0x153   : > { %v827_v55 = vpack.c.bf16 %v3650_v54, %v3648_v53 }
 0x155   : > { %1003 = vmatmul.bf16.gmra.mxu1 %v827_v55  ;;  %1032 = vmatmul.bf16.gmra.mxu2 %v827_v55 }
 0x156   : > { %1061 = vmatmul.bf16.gmra.mxu3 %v827_v55 }
 0x158   : > { %v807_v56 = vpop.f32.mrf.mxu0 }
 0x159   : > { %v3654_v58 = vadd.f32 %v817_v46, %v807_v56 }
 0x160   : > { %v809_v57 = vpop.f32.mrf.mxu0 }
 0x161   : > { %v3656_v59 = vadd.f32 %v817_v46, %v809_v57 }
 0x163   : > { %v828_v60 = vpack.c.bf16 %v3656_v59, %v3654_v58 }
 0x165   : > { %1008 = vmatmul.bf16.gmra.mxu1 %v828_v60  ;;  %1037 = vmatmul.bf16.gmra.mxu2 %v828_v60 }
 0x166   : > { %1066 = vmatmul.bf16.gmra.mxu3 %v828_v60 }
 0x168   : > { %v812_v61 = vpop.f32.mrf.mxu0 }
 0x169   : > { %v3660_v63 = vadd.f32 %v817_v46, %v812_v61 }
 0x170   : > { %v814_v62 = vpop.f32.mrf.mxu0 }
 0x171   : > { %v3662_v0 = vadd.f32 %v817_v46, %v814_v62 }
 0x173   : > { %v829_v1 = vpack.c.bf16 %v3662_v0, %v3660_v63 }
 0x175   : > { %1013 = vmatmul.bf16.gmra.mxu1 %v829_v1  ;;  %1042 = vmatmul.bf16.gmra.mxu2 %v829_v1 }
 0x176   : > { %1071 = vmatmul.bf16.gmra.mxu3 %v829_v1 }
 0x1c2   : > { %v999_v2 = vpop.f32.mrf.mxu1 }
 0x1c3   : > { %v1077_v7 = vpack.c.bf16 %v999_v2, %v999_v2  ;;  %v1101_v2 = vld [vmem:[%s3678_s24] sm:$0x1] }
 0x1c8   : > { %v1028_v3 = vpop.f32.mrf.mxu2 }
 0x1c9   : > { %v1085_v4 = vpack.c.bf16 %v1028_v3, %v1028_v3  ;;  %v1057_v5 = vpop.f32.mrf.mxu3  ;;  %v2730_v3 = vadd.f32 -1.0, %v1101_v2 }
 0x1ca   : > { %v1001_v6 = vpop.f32.mrf.mxu1  ;;  %v1093_v23 = vpack.c.bf16 %v1057_v5, %v1057_v5  ;;  %v1102_v5 = vld [vmem:[%s3678_s24 + $0x1] sm:$0x1] }
 0x1cb   : > { %1156 = vmatpush.bf16.xpose.msrb.mxu1 %v1085_v4  ;;  %v1078_v12 = vpack.c.bf16 %v1001_v6, %v1001_v6  ;;  %v1117_v4 = vmul.f32 1e+09, %v2730_v3 }
 0x1cc   : > { %v1355_v29 = vsel %vm1353_vm9, %v1093_v23, 0 }
 0x1cd   : > { %v1133_v6 = vperm.slane %v1117_v4, 0 }
 0x1d0   : > { %v1030_v8 = vpop.f32.mrf.mxu2 }
 0x1d1   : > { %v1086_v9 = vpack.c.bf16 %v1030_v8, %v1030_v8  ;;  %v1059_v10 = vpop.f32.mrf.mxu3 }
 0x1d2   : > { %1157 = vmatmul.bf16.vlgmr.msrb.gmra.mxu1 %v1077_v7  ;;  %v1004_v11 = vpop.f32.mrf.mxu1  ;;  %v1094_v16 = vpack.c.bf16 %v1059_v10, %v1059_v10  ;;  %v2731_v7 = vadd.f32 -1.0, %v1102_v5 }
 0x1d3   : > { %1169 = vmatpush.bf16.xpose.msrb.mxu0 %v1086_v9  ;;  %v1079_v18 = vpack.c.bf16 %v1004_v11, %v1004_v11  ;;  %v1103_v11 = vld [vmem:[%s3678_s24 + $0x2] sm:$0x1] }
 0x1d4   : > { %v1374_v36 = vsel %vm1353_vm9, %v1094_v16, 0  ;;  %v1118_v10 = vmul.f32 1e+09, %v2731_v7  ;;  %v1105_v16 = vld [vmem:[%s3678_s24 + $0x4] sm:$0x1] }
 0x1d8   : > { %v1033_v13 = vpop.f32.mrf.mxu2 }
 0x1d9   : > { %v1087_v14 = vpack.c.bf16 %v1033_v13, %v1033_v13  ;;  %v1062_v15 = vpop.f32.mrf.mxu3  ;;  %v1134_v13 = vperm.slane %v1118_v10, 0 }
 0x1da   : > { %1170 = vmatmul.bf16.vlgmr.msrb.gmra.mxu0 %v1078_v12  ;;  %v1006_v17 = vpop.f32.mrf.mxu1  ;;  %v1095_v38 = vpack.c.bf16 %v1062_v15, %v1062_v15 }
 0x1db   : > { %1182 = vmatpush.bf16.xpose.msra.mxu1 %v1087_v14  ;;  %v1080_v25 = vpack.c.bf16 %v1006_v17, %v1006_v17  ;;  %v2732_v14 = vadd.f32 -1.0, %v1103_v11 }
 0x1dc   : > { %v1393_v44 = vsel %vm1353_vm9, %v1095_v38, 0 }
 0x1e0   : > { %v1035_v20 = vpop.f32.mrf.mxu2 }
 0x1e1   : > { %v1088_v21 = vpack.c.bf16 %v1035_v20, %v1035_v20  ;;  %v1064_v22 = vpop.f32.mrf.mxu3  ;;  %v1119_v20 = vmul.f32 1e+09, %v2732_v14 }
 0x1e2   : > { %1183 = vmatmul.bf16.vlgmr.msra.gmra.mxu1 %v1079_v18  ;;  %v1009_v24 = vpop.f32.mrf.mxu1  ;;  %v1096_v47 = vpack.c.bf16 %v1064_v22, %v1064_v22 }
 0x1e3   : > { %1195 = vmatpush.bf16.xpose.msrb.mxu2 %v1088_v21  ;;  %v1081_v31 = vpack.c.bf16 %v1009_v24, %v1009_v24  ;;  %v1135_v22 = vperm.slane %v1119_v20, 0 }
 0x1e4   : > { %v1412_v56 = vsel %vm1353_vm9, %v1096_v47, 0 }
 0x1e8   : > { %v1038_v26 = vpop.f32.mrf.mxu2 }
 0x1e9   : > { %v1089_v27 = vpack.c.bf16 %v1038_v26, %v1038_v26  ;;  %v1067_v28 = vpop.f32.mrf.mxu3 }
 0x1ea   : > { %1196 = vmatmul.bf16.vlgmr.msrb.gmra.mxu2 %v1080_v25  ;;  %v1097_v30 = vpack.c.bf16 %v1067_v28, %v1067_v28  ;;  %v1011_v33 = vpop.f32.mrf.mxu1  ;;  %v1104_v25 = vld [vmem:[%s3678_s24 + $0x3] sm:$0x1] }
 0x1eb   : > { %1208 = vmatpush.bf16.xpose.msrb.mxu3 %v1089_v27  ;;  %v1082_v39 = vpack.c.bf16 %v1011_v33, %v1011_v33  ;;  %v2733_v28 = vadd.f32 -1.0, %v1104_v25  ;;  %v2734_v33 = vadd.f32 -1.0, %v1105_v16 }
 0x1ec   : > { %v1431_v35 = vsel %vm1353_vm9, %v1097_v30, 0 }
 0x1f0   : > { %v1040_v32 = vpop.f32.mrf.mxu2 }
 0x1f1   : > { %v1090_v19 = vpack.c.bf16 %v1040_v32, %v1040_v32  ;;  %v1069_v34 = vpop.f32.mrf.mxu3 }
 0x1f2   : > { %1209 = vmatmul.bf16.vlgmr.msrb.gmra.mxu3 %v1081_v31  ;;  %v1098_v37 = vpack.c.bf16 %v1069_v34, %v1069_v34  ;;  %v1014_v45 = vpop.f32.mrf.mxu1  ;;  %v1106_v31 = vld [vmem:[%s3678_s24 + $0x5] sm:$0x1] }
 0x1f3   : > { %1364 = vmatpush.bf16.msra.mxu3 %v1355_v29  ;;  %1221 = vmatpush.bf16.xpose.msra.mxu0 %v1090_v19  ;;  %v1083_v50 = vpack.c.bf16 %v1014_v45, %v1014_v45  ;;  %v1120_v29 = vmul.f32 1e+09, %v2733_v28  ;;  %v2735_v19 = vadd.f32 -1.0, %v1106_v31 }
 0x1f4   : > { %v1450_v43 = vsel %vm1353_vm9, %v1098_v37, 0 }
 0x1f5   : > { %v1136_v32 = vperm.slane %v1120_v29, 0  ;;  %v1122_v38 = vmul.f32 1e+09, %v2735_v19 }
 0x1f7   : > { %1440 = vmatpush.bf16.msrb.mxu3 %v1431_v35 }
 0x1f8   : > { %v1043_v40 = vpop.f32.mrf.mxu2 }
 0x1f9   : > { %v1091_v41 = vpack.c.bf16 %v1043_v40, %v1043_v40  ;;  %v1072_v42 = vpop.f32.mrf.mxu3 }
 0x1fa   : > { %1222 = vmatmul.bf16.vlgmr.msra.gmra.mxu0 %v1082_v39  ;;  %v1099_v46 = vpack.c.bf16 %v1072_v42, %v1072_v42  ;;  %v1016_v60 = vpop.f32.mrf.mxu1  ;;  %v1107_v39 = vld [vmem:[%s3678_s24 + $0x6] sm:$0x1] }
 0x1fb   : > { %1383 = vmatpush.bf16.msrb.mxu0 %v1374_v36  ;;  %1234 = vmatpush.bf16.xpose.msrb.mxu1 %v1091_v41  ;;  %v1084_v62 = vpack.c.bf16 %v1016_v60, %v1016_v60  ;;  %v1121_v36 = vmul.f32 1e+09, %v2734_v33  ;;  %v1138_v41 = vperm.slane %v1122_v38, 0  ;;  %v2736_v42 = vadd.f32 -1.0, %v1107_v39 }
 0x1fc   : > { %v1469_v55 = vsel %vm1353_vm9, %v1099_v46, 0 }
 0x1fd   : > { %v1137_v40 = vperm.slane %v1121_v36, 0 }
 0x1ff   : > { %1459 = vmatpush.bf16.msra.mxu0 %v1450_v43 }
 0x200   : > { %v1045_v51 = vpop.f32.mrf.mxu2 }
 0x201   : > { %v1092_v52 = vpack.c.bf16 %v1045_v51, %v1045_v51  ;;  %v1074_v57 = vpop.f32.mrf.mxu3  ;;  %v1123_v51 = vmul.f32 1e+09, %v2736_v42 }
 0x202   : > { %1235 = vmatmul.bf16.vlgmr.msrb.gmra.mxu1 %v1083_v50  ;;  %v1100_v61 = vpack.c.bf16 %v1074_v57, %v1074_v57 }
 0x203   : > { %1402 = vmatpush.bf16.msra.mxu1 %v1393_v44  ;;  %1247 = vmatpush.bf16.xpose.msra.mxu2 %v1092_v52 }
 0x204   : > { %v1488_v1 = vsel %vm1353_vm9, %v1100_v61, 0  ;;  %v1108_v61 = vld [vmem:[%s3678_s24 + $0x7] sm:$0x1] }
 0x205   : > { %v2737_v2 = vadd.f32 -1.0, %v1108_v61 }
 0x207   : > { %1478 = vmatpush.bf16.msrb.mxu1 %v1469_v55  ;;  %v1139_v55 = vperm.slane %v1123_v51, 0  ;;  %v1124_v3 = vmul.f32 1e+09, %v2737_v2 }
 0x209   : > { %v1140_v5 = vperm.slane %v1124_v3, 0 }
 0x20a   : > { %1248 = vmatmul.bf16.vlgmr.msra.gmra.mxu2 %v1084_v62 }
 0x20b   : > { %1421 = vmatpush.bf16.msrb.mxu2 %v1412_v56 }
 0x20f   : > { %1497 = vmatpush.bf16.msra.mxu2 %v1488_v1 }
 0x24f   : > { %v1158_v8 = vpop.f32.mrf.mxu1 }
 0x250   : > { %v3682_v9 = vadd.f32 %v1158_v8, %v1133_v6 }
 0x252   : > { %v1254_v12 = vsel %vm1253_vm10, %v3682_v9, -inf }
 0x253   : > { %1255 = vmax.xlane.f32.xlu2 %v1254_v12 }
 0x257   : > { %v1160_v15 = vpop.f32.mrf.mxu1  ;;  %v1171_v17 = vpop.f32.mrf.mxu0 }
 0x258   : > { %v3687_v18 = vadd.f32 %v1171_v17, %v1134_v13 }
 0x25a   : > { %v1257_v21 = vsel %vm1253_vm10, %v3687_v18, -inf }
 0x25b   : > { %1258 = vmax.xlane.f32.xlu1 %v1257_v21 }
 0x25f   : > { %v1173_v23 = vpop.f32.mrf.mxu0  ;;  %v1184_v24 = vpop.f32.mrf.mxu1 }
 0x260   : > { %v1185_v26 = vadd.f32 %v1184_v24, %v1135_v22 }
 0x262   : > { %v1260_v27 = vsel %vm1253_vm10, %v1185_v26, -inf }
 0x263   : > { %1261 = vmax.xlane.f32.xlu2 %v1260_v27 }
 0x267   : > { %v1186_v30 = vpop.f32.mrf.mxu1 }
 0x26d   : > { %v1197_v34 = vpop.f32.mrf.mxu2 }
 0x26e   : > { %v1198_v35 = vadd.f32 %v1197_v34, %v1136_v32 }
 0x270   : > { %v1263_v37 = vsel %vm1253_vm10, %v1198_v35, -inf }
 0x271   : > { %1264 = vmax.xlane.f32.xlu0 %v1263_v37 }
 0x275   : > { %v1199_v43 = vpop.f32.mrf.mxu2  ;;  %v1210_v44 = vpop.f32.mrf.mxu3 }
 0x276   : > { %v1211_v45 = vadd.f32 %v1210_v44, %v1137_v40 }
 0x277   : > { %v1223_v46 = vpop.f32.mrf.mxu0 }
 0x278   : > { %v1224_v47 = vadd.f32 %v1223_v46, %v1138_v41  ;;  %v1266_v50 = vsel %vm1253_vm10, %v1211_v45, -inf }
 0x279   : > { %1267 = vmax.xlane.f32.xlu2 %v1266_v50 }
 0x27a   : > { %v1269_v52 = vsel %vm1253_vm10, %v1224_v47, -inf }
 0x27b   : > { %1270 = vmax.xlane.f32.xlu1 %v1269_v52 }
 0x27d   : > { %v1212_v56 = vpop.f32.mrf.mxu3 }
 0x27f   : > { %v1225_v57 = vpop.f32.mrf.mxu0  ;;  %v1236_v60 = vpop.f32.mrf.mxu1 }
 0x280   : > { %v1237_v62 = vadd.f32 %v1236_v60, %v1139_v55 }
 0x282   : > { %v1272_v1 = vsel %vm1253_vm10, %v1237_v62, -inf }
 0x283   : > { %1273 = vmax.xlane.f32.xlu2 %v1272_v1 }
 0x287   : > { %v1238_v4 = vpop.f32.mrf.mxu1 }
 0x28d   : > { %v1249_v6 = vpop.f32.mrf.mxu2 }
 0x28e   : > { %v1250_v7 = vadd.f32 %v1249_v6, %v1140_v5 }
 0x290   : > { %v1275_v8 = vsel %vm1253_vm10, %v1250_v7, -inf }
 0x291   : > { %1276 = vmax.xlane.f32.xlu0 %v1275_v8 }
 0x295   : > { %v1251_v10 = vpop.f32.mrf.mxu2 }
 0x2c6   : > { %v1256_v11 = vpop.xlane.xlu2 %1255 }
 0x2c7   : > { %v1278_v12 = vsub.f32 %v3682_v9, %v1256_v11 }
 0x2c9   : > { %v1286_v13 = vmul.f32 1.442695, %v1278_v12 }
 0x2cb   : > { %3126 = vpow2.f32 %v1286_v13 }
 0x2ce   : > { %v1259_v14 = vpop.xlane.xlu1 %1258 }
 0x2cf   : > { %v1279_v15 = vsub.f32 %v3687_v18, %v1259_v14 }
 0x2d1   : > { %v3127_v17 = vpop.eup %3126  ;;  %v1288_v20 = vmul.f32 1.442695, %v1279_v15 }
 0x2d2   : > { %v1302_v21 = vsel %vm1253_vm10, %v3127_v17, 0.0 }
 0x2d3   : > { %3128 = vpow2.f32 %v1288_v20  ;;  %1303 = vadd.xlane.f32.xlu0 %v1302_v21 }
 0x2d6   : > { %v1262_v22 = vpop.xlane.xlu2 %1261 }
 0x2d7   : > { %v1280_v23 = vsub.f32 %v1185_v26, %v1262_v22 }
 0x2d9   : > { %v3129_v24 = vpop.eup %3128  ;;  %v1290_v25 = vmul.f32 1.442695, %v1280_v23 }
 0x2da   : > { %v1305_v27 = vsel %vm1253_vm10, %v3129_v24, 0.0 }
 0x2db   : > { %3130 = vpow2.f32 %v1290_v25  ;;  %1306 = vadd.xlane.f32.xlu2 %v1305_v27 }
 0x2e1   : > { %v3131_v9 = vpop.eup %3130 }
 0x2e2   : > { %v1308_v28 = vsel %vm1253_vm10, %v3131_v9, 0.0 }
 0x2e3   : > { %1309 = vadd.xlane.f32.xlu0 %v1308_v28 }
 0x2e4   : > { %v1265_v29 = vpop.xlane.xlu0 %1264 }
 0x2e5   : > { %v1281_v18 = vsub.f32 %v1198_v35, %v1265_v29 }
 0x2e7   : > { %v1292_v30 = vmul.f32 1.442695, %v1281_v18 }
 0x2e9   : > { %3132 = vpow2.f32 %v1292_v30 }
 0x2ec   : > { %v1268_v16 = vpop.xlane.xlu2 %1267 }
 0x2ed   : > { %v1282_v31 = vsub.f32 %v1211_v45, %v1268_v16 }
 0x2ee   : > { %v1271_v32 = vpop.xlane.xlu1 %1270 }
 0x2ef   : > { %v3133_v33 = vpop.eup %3132  ;;  %v1294_v19 = vmul.f32 1.442695, %v1282_v31  ;;  %v1283_v26 = vsub.f32 %v1224_v47, %v1271_v32  ;;  %v2977_v31 = vld [vmem:[#allocation8 + $0x38] sm:$0xff] }
 0x2f0   : > { %v1311_v34 = vsel %vm1253_vm10, %v3133_v33, 0.0 }
 0x2f1   : > { %3134 = vpow2.f32 %v1294_v19  ;;  %v1296_v36 = vmul.f32 1.442695, %v1283_v26  ;;  %1312 = vadd.xlane.f32.xlu1 %v1311_v34  ;;  %v2976_v19 = vld [vmem:[#allocation8 + $0x30] sm:$0xff]  ;;  %v2975_v26 = vld [vmem:[#allocation8 + $0x28] sm:$0xff] }
 0x2f3   : > { %3136 = vpow2.f32 %v1296_v36  ;;  %v2974_v36 = vld [vmem:[#allocation8 + $0x20] sm:$0xff] }
 0x2f6   : > { %v1274_v37 = vpop.xlane.xlu2 %1273 }
 0x2f7   : > { %v3135_v38 = vpop.eup %3134  ;;  %v1284_v39 = vsub.f32 %v1237_v62, %v1274_v37  ;;  %v2973_v37 = vld [vmem:[#allocation8 + $0x18] sm:$0xff] }
 0x2f8   : > { %v1314_v40 = vsel %vm1253_vm10, %v3135_v38, 0.0 }
 0x2f9   : > { %v3137_v35 = vpop.eup %3136  ;;  %v1298_v41 = vmul.f32 1.442695, %v1284_v39  ;;  %1315 = vadd.xlane.f32.xlu1 %v1314_v40  ;;  %v2971_v40 = vld [vmem:[#allocation8 + $0x8] sm:$0xff] }
 0x2fa   : > { %v1317_v42 = vsel %vm1253_vm10, %v3137_v35, 0.0 }
 0x2fb   : > { %3138 = vpow2.f32 %v1298_v41  ;;  %1318 = vadd.xlane.f32.xlu0 %v1317_v42  ;;  %v2970_v41 = vld [vmem:[#allocation8] sm:$0xff] }
 0x301   : > { %v3139_v43 = vpop.eup %3138 }
 0x302   : > { %v1320_v44 = vsel %vm1253_vm10, %v3139_v43, 0.0 }
 0x303   : > { %1321 = vadd.xlane.f32.xlu1 %v1320_v44 }
 0x304   : > { %v1277_v45 = vpop.xlane.xlu0 %1276 }
 0x305   : > { %v1285_v46 = vsub.f32 %v1250_v7, %v1277_v45 }
 0x307   : > { %v1300_v47 = vmul.f32 1.442695, %v1285_v46 }
 0x309   : > { %3140 = vpow2.f32 %v1300_v47 }
 0x30f   : > { %v3141_v50 = vpop.eup %3140 }
 0x310   : > { %v1323_v51 = vsel %vm1253_vm10, %v3141_v50, 0.0 }
 0x311   : > { %1324 = vadd.xlane.f32.xlu2 %v1323_v51 }
 0x346   : > { %v1304_v52 = vpop.xlane.xlu0 %1303 }
 0x347   : > { %3142 = vrcp.f32 %v1304_v52 }
 0x34d   : > { %v3143_v55 = vpop.eup %3142 }
 0x34e   : > { %v1334_v56 = vmul.f32 %v3143_v55, %v3127_v17  ;;  %v1307_v57 = vpop.xlane.xlu2 %1306 }
 0x34f   : > { %3144 = vrcp.f32 %v1307_v57 }
 0x350   : > { %v1342_v60 = vpack.c.bf16 %v1334_v56, %v1334_v56 }
 0x352   : > { %2738 = vmatmul.msk.bf16.vlgmr.msra.gmra.mxu3 %vm1253_vm10, %v1342_v60 }
 0x353   : > { %1614 = vmatpush.bf16.msra.mxu3 %v2977_v31 }
 0x355   : > { %v3145_v61 = vpop.eup %3144 }
 0x356   : > { %v1335_v62 = vmul.f32 %v3145_v61, %v3129_v24  ;;  %v1310_v1 = vpop.xlane.xlu0 %1309 }
 0x357   : > { %3146 = vrcp.f32 %v1310_v1  ;;  %1615 = vmatpush.bf16.msra.mxu3 %v2976_v19 }
 0x358   : > { %v1343_v2 = vpack.c.bf16 %v1335_v62, %v1335_v62 }
 0x35a   : > { %2739 = vmatmul.msk.bf16.vlgmr.msrb.gmra.mxu0 %vm1253_vm10, %v1343_v2 }
 0x35b   : > { %1616 = vmatpush.bf16.msra.mxu3 %v2975_v26 }
 0x35d   : > { %v3147_v3 = vpop.eup %3146 }
 0x35e   : > { %v1336_v4 = vmul.f32 %v3147_v3, %v3131_v9 }
 0x35f   : > { %1617 = vmatpush.bf16.msra.mxu3 %v2974_v36 }
 0x360   : > { %v1344_v5 = vpack.c.bf16 %v1336_v4, %v1336_v4 }
 0x362   : > { %2740 = vmatmul.msk.bf16.vlgmr.msra.gmra.mxu1 %vm1253_vm10, %v1344_v5 }
 0x363   : > { %1618 = vmatpush.bf16.msra.mxu3 %v2973_v37 }
 0x364   : > { %v1313_v6 = vpop.xlane.xlu1 %1312 }
 0x365   : > { %3148 = vrcp.f32 %v1313_v6 }
 0x36b   : > { %v3149_v7 = vpop.eup %3148 }
 0x36c   : > { %v1337_v8 = vmul.f32 %v3149_v7, %v3133_v33  ;;  %v1316_v10 = vpop.xlane.xlu1 %1315 }
 0x36d   : > { %3150 = vrcp.f32 %v1316_v10 }
 0x36e   : > { %v1345_v11 = vpack.c.bf16 %v1337_v8, %v1337_v8  ;;  %v1319_v12 = vpop.xlane.xlu0 %1318 }
 0x36f   : > { %3152 = vrcp.f32 %v1319_v12 }
 0x370   : > { %2741 = vmatmul.msk.bf16.vlgmr.msrb.gmra.mxu2 %vm1253_vm10, %v1345_v11 }
 0x373   : > { %v3151_v13 = vpop.eup %3150 }
 0x374   : > { %v1338_v14 = vmul.f32 %v3151_v13, %v3135_v38  ;;  %v2972_v38 = vld [vmem:[#allocation8 + $0x10] sm:$0xff] }
 0x375   : > { %v3153_v15 = vpop.eup %3152  ;;  %1619 = vmatpush.bf16.msra.mxu3 %v2972_v38 }
 0x376   : > { %v1346_v17 = vpack.c.bf16 %v1338_v14, %v1338_v14  ;;  %v1339_v20 = vmul.f32 %v3153_v15, %v3137_v35  ;;  %v1322_v21 = vpop.xlane.xlu1 %1321 }
 0x377   : > { %3154 = vrcp.f32 %v1322_v21 }
 0x378   : > { %v1347_v22 = vpack.c.bf16 %v1339_v20, %v1339_v20  ;;  %2742 = vmatmul.msk.bf16.vlgmr.msrb.gmra.mxu3 %vm1253_vm10, %v1346_v17 }
 0x379   : > { %1620 = vmatpush.bf16.msra.mxu3 %v2971_v40 }
 0x37a   : > { %2743 = vmatmul.msk.bf16.vlgmr.msra.gmra.mxu0 %vm1253_vm10, %v1347_v22 }
 0x37d   : > { %v3155_v23 = vpop.eup %3154  ;;  %1621 = vmatpush.bf16.msra.mxu3 %v2970_v41 }
 0x37e   : > { %v1340_v24 = vmul.f32 %v3155_v23, %v3139_v43 }
 0x380   : > { %v1348_v25 = vpack.c.bf16 %v1340_v24, %v1340_v24 }
 0x382   : > { %2744 = vmatmul.msk.bf16.vlgmr.msrb.gmra.mxu1 %vm1253_vm10, %v1348_v25 }
 0x384   : > { %v1325_v27 = vpop.xlane.xlu2 %1324 }
 0x385   : > { %3156 = vrcp.f32 %v1325_v27 }
 0x38b   : > { %v3157_v9 = vpop.eup %3156 }
 0x38c   : > { %v1341_v28 = vmul.f32 %v3157_v9, %v3141_v50 }
 0x38e   : > { %v1349_v29 = vpack.c.bf16 %v1341_v28, %v1341_v28 }
 0x390   : > { %2745 = vmatmul.msk.bf16.vlgmr.msra.gmra.mxu2 %vm1253_vm10, %v1349_v29 }
 0x3d5   : > { %v1366_v18 = vpop.f32.mrf.mxu3 }
 0x3d6   : > { %v1503_v60 = vpack.c.bf16 %v1366_v18, %v1366_v18 }
 0x3d7   : > { %v1385_v30 = vpop.f32.mrf.mxu0 }
 0x3d8   : > { %v1504_v47 = vpack.c.bf16 %v1385_v30, %v1385_v30  ;;  %v1535_v5 = vunpack.c.l.b16 %v1503_v60 }
 0x3da   : > { %v1536_v56 = vunpack.c.l.b16 %v1504_v47 }
 0x3dc   : > { %v1543_v2 = vrot.slane %v1536_v56, 7 }
 0x3dd   : > { %v1368_v16 = vpop.f32.mrf.mxu3 }
 0x3de   : > { %v1545_v10 = vsel %vm1544_vm11, %v1543_v2, %v1535_v5 }
 0x3df   : > { %v1387_v32 = vpop.f32.mrf.mxu0  ;;  %v1404_v33 = vpop.f32.mrf.mxu1 }
 0x3e0   : > { %v1505_v50 = vpack.c.bf16 %v1404_v33, %v1404_v33 }
 0x3e2   : > { %v1537_v57 = vunpack.c.l.b16 %v1505_v50  ;;  %v3407_v50 = vmov 128.0  }
 0x3e3   : > { %3158 = vrcp.f32 %v3407_v50  ;;  %v2812_v50 = vld [vmem:[%s4063_s8 + $0x40] sm:$0xf] }
 0x3e4   : > { %v1546_v4 = vrot.slane %v1537_v57, 6 }
 0x3e6   : > { %v1548_v12 = vsel %vm1547_vm12, %v1546_v4, %v1545_v10 }
 0x3e7   : > { %v1406_v34 = vpop.f32.mrf.mxu1 }
 0x3f3   : > { %v1423_v39 = vpop.f32.mrf.mxu2 }
 0x3f4   : > { %v1506_v52 = vpack.c.bf16 %v1423_v39, %v1423_v39 }
 0x3f6   : > { %v1538_v61 = vunpack.c.l.b16 %v1506_v52 }
 0x3f7   : > { %v1461_v35 = vpop.f32.mrf.mxu0 }
 0x3f8   : > { %v1508_v3 = vpack.c.bf16 %v1461_v35, %v1461_v35  ;;  %v1549_v6 = vrot.slane %v1538_v61, 5 }
 0x3fa   : > { %v1540_v11 = vunpack.c.l.b16 %v1508_v3  ;;  %v1551_v14 = vsel %vm1550_vm13, %v1549_v6, %v1548_v12 }
 0x3fb   : > { %v1425_v42 = vpop.f32.mrf.mxu2  ;;  %v1442_v43 = vpop.f32.mrf.mxu3 }
 0x3fc   : > { %v1507_v55 = vpack.c.bf16 %v1442_v43, %v1442_v43  ;;  %v1555_v21 = vrot.slane %v1540_v11, 3 }
 0x3fe   : > { %v1539_v62 = vunpack.c.l.b16 %v1507_v55 }
 0x3ff   : > { %v1463_v44 = vpop.f32.mrf.mxu0  ;;  %v1480_v45 = vpop.f32.mrf.mxu1 }
 0x400   : > { %v1509_v1 = vpack.c.bf16 %v1480_v45, %v1480_v45  ;;  %v1552_v7 = vrot.slane %v1539_v62, 4 }
 0x402   : > { %v1541_v8 = vunpack.c.l.b16 %v1509_v1  ;;  %v1554_v17 = vsel %vm1553_vm14, %v1552_v7, %v1551_v14 }
 0x403   : > { %v1444_v46 = vpop.f32.mrf.mxu3  ;;  %v1557_v23 = vsel %vm1556_vm15, %v1555_v21, %v1554_v17 }
 0x404   : > { %v1558_v20 = vrot.slane %v1541_v8, 2 }
 0x406   : > { %v1560_v25 = vsel %vm1559_vm0, %v1558_v20, %v1557_v23 }
 0x407   : > { %v1482_v51 = vpop.f32.mrf.mxu1 }
 0x408   : > { %v3159_v51 = vpop.eup %3158 }
 0x409   : > { %v1677_v52 = vmul.f32 128.0, %v3159_v51  ;;  %vm1681_vm2 = vweird.f32 %v3159_v51 }
 0x40b   : > { %v1678_v55 = vsub.f32 1.0, %v1677_v52  ;;  %v2986_v52 = vld [vmem:[%s4063_s8 + $0x44] sm:$0xf] }
 0x40d   : > { %v1679_v56 = vmul.f32 %v3159_v51, %v1678_v55 }
 0x40f   : > { %v1680_v57 = vadd.f32 %v3159_v51, %v1679_v56  ;;  %v2814_v56 = vld [vmem:[%s4063_s8 + $0x48] sm:$0xf0] }
 0x411   : > { %v3742_v60 = vsel %vm1681_vm2, %v3159_v51, %v1680_v57  ;;  %v2987_v51 = vld [vmem:[%s4063_s8 + $0x44] sm:$0xf0]  ;;  %v2817_v57 = vor.u32 %v2986_v52, %v2814_v56 }
 0x412   : > { %v2813_v55 = vor.u32 %v2987_v51, %v2812_v50 }
 0x413   : > { %v1499_v13 = vpop.f32.mrf.mxu2 }
 0x414   : > { %v1510_v15 = vpack.c.bf16 %v1499_v13, %v1499_v13 }
 0x416   : > { %v1542_v22 = vunpack.c.l.b16 %v1510_v15 }
 0x418   : > { %v1561_v24 = vrot.slane %v1542_v22, 1 }
 0x41a   : > { %v1563_v27 = vsel %vm1562_vm1, %v1561_v24, %v1560_v25 }
 0x41b   : > { %v1564_v9 = vpack.c.b16 %v1563_v27, %v1563_v27  ;;  %v1501_v28 = vpop.f32.mrf.mxu2 }
 0x41d   : > { %1622 = vmatmul.bf16.vlgmr.msra.gmra.mxu3 %v1564_v9 }
 0x4a0   : > { %v1623_v29 = vpop.f32.mrf.mxu3 }
 0x4a1   : > { %v1628_v18 = vrot.slane %v1623_v29, 1  ;;  %v1629_v30 = vrot.slane %v1623_v29, 2  ;;  %v1630_v16 = vrot.slane %v1623_v29, 3  ;;  %v1631_v31 = vrot.slane %v1623_v29, 4 }
 0x4a2   : > { %v1632_v32 = vrot.slane %v1623_v29, 5  ;;  %v1633_v33 = vrot.slane %v1623_v29, 6  ;;  %v1634_v19 = vrot.slane %v1623_v29, 7  ;;  %v1643_v38 = vadd.f32 %v1623_v29, %v3642_v48 }
 0x4a3   : > { %v1644_v26 = vadd.f32 %v1628_v18, %v3644_v49  ;;  %v1645_v34 = vadd.f32 %v1629_v30, %v3648_v53  ;;  %v1646_v36 = vadd.f32 %v1630_v16, %v3650_v54  ;;  %v1647_v37 = vadd.f32 %v1631_v31, %v3654_v58 }
 0x4a4   : > { %v1648_v39 = vadd.f32 %v1632_v32, %v3656_v59  ;;  %v1649_v41 = vadd.f32 %v1633_v33, %v3660_v63  ;;  %v1650_v42 = vadd.f32 %v1634_v19, %v3662_v0 }
 0x4a5   : > { %v1659_v40 = vrot.slane %v1644_v26, 7  ;;  %v1661_v35 = vrot.slane %v1645_v34, 6  ;;  %v1663_v44 = vrot.slane %v1646_v36, 5  ;;  %v1665_v45 = vrot.slane %v1647_v37, 4 }
 0x4a6   : > { %v1667_v58 = vrot.slane %v1648_v39, 3  ;;  %v1669_v46 = vrot.slane %v1649_v41, 2  ;;  %v1671_v47 = vrot.slane %v1650_v42, 1 }
 0x4a7   : > { %v1660_v43 = vsel %vm1544_vm11, %v1659_v40, %v1643_v38  ;;  %v2993_v40 = vld [vmem:[%s4063_s8 + $0x74] sm:$0xf0] }
 0x4a8   : > { %v1625_v49 = vpop.f32.mrf.mxu3  ;;  %v1662_v53 = vsel %vm1547_vm12, %v1661_v35, %v1660_v43  ;;  %v2992_v35 = vld [vmem:[%s4063_s8 + $0x74] sm:$0xf] }
 0x4a9   : > { %v1664_v54 = vsel %vm1550_vm13, %v1663_v44, %v1662_v53  ;;  %v2828_v44 = vld [vmem:[%s4063_s8 + $0x60] sm:$0xf]  ;;  %v2991_v49 = vld [vmem:[%s4063_s8 + $0x64] sm:$0xf0]  ;;  %v2990_v53 = vld [vmem:[%s4063_s8 + $0x64] sm:$0xf] }
 0x4aa   : > { %v1666_v48 = vsel %vm1553_vm14, %v1665_v45, %v1664_v54  ;;  %v2829_v45 = vor.u32 %v2991_v49, %v2828_v44  ;;  %v2830_v54 = vld [vmem:[%s4063_s8 + $0x68] sm:$0xf0] }
 0x4ab   : > { %v1668_v59 = vsel %vm1556_vm15, %v1667_v58, %v1666_v48  ;;  %v2833_v58 = vor.u32 %v2990_v53, %v2830_v54  ;;  %v2820_v48 = vld [vmem:[%s4063_s8 + $0x50] sm:$0xf] }
 0x4ac   : > { %v1670_v63 = vsel %vm1559_vm0, %v1669_v46, %v1668_v59  ;;  %v2989_v46 = vld [vmem:[%s4063_s8 + $0x54] sm:$0xf0]  ;;  %v2988_v59 = vld [vmem:[%s4063_s8 + $0x54] sm:$0xf] }
 0x4ad   : > { %v1672_v0 = vsel %vm1562_vm1, %v1671_v47, %v1670_v63  ;;  %v2821_v47 = vor.u32 %v2989_v46, %v2820_v48  ;;  %v2822_v63 = vld [vmem:[%s4063_s8 + $0x58] sm:$0xf0] }
 0x4ae   : > { %1674 = vadd.xlane.f32.xlu2 %v1672_v0  ;;  %v2825_v0 = vor.u32 %v2988_v59, %v2822_v63  ;;  %v3119_v59 = vld [vmem:[%s4062_s7] ss:$0 sm:$0xff] }
 0x521   : > { %v1675_v61 = vpop.xlane.xlu2 %1674 }
 0x522   : > { %v1683_v62 = vmul.f32 %v3742_v60, %v1675_v61  ;;  %v2804_v61 = vld [vmem:[%s4063_s8 + $0x30] sm:$0xf] }
 0x524   : > { %v1685_v1 = vrot.slane %v1683_v62, 1  ;;  %v1686_v2 = vrot.slane %v1683_v62, 2  ;;  %v1687_v3 = vrot.slane %v1683_v62, 3  ;;  %v1688_v4 = vrot.slane %v1683_v62, 4 }
 0x525   : > { %v1689_v5 = vrot.slane %v1683_v62, 5  ;;  %v1690_v6 = vrot.slane %v1683_v62, 6  ;;  %v1691_v7 = vrot.slane %v1683_v62, 7  ;;  %v3745_v8 = vsub.f32 %v1643_v38, %v1683_v62  ;;  %v2985_v62 = vld [vmem:[%s4063_s8 + $0x34] sm:$0xf0] }
 0x526   : > { %v3747_v10 = vsub.f32 %v1644_v26, %v1685_v1  ;;  %v3749_v11 = vsub.f32 %v1645_v34, %v1686_v2  ;;  %v3751_v12 = vsub.f32 %v1646_v36, %v1687_v3  ;;  %v3753_v13 = vsub.f32 %v1647_v37, %v1688_v4  ;;  %v2984_v1 = vld [vmem:[%s4063_s8 + $0x34] sm:$0xf]  ;;  %v2806_v3 = vld [vmem:[%s4063_s8 + $0x38] sm:$0xf0] }
 0x527   : > { %v3755_v14 = vsub.f32 %v1648_v39, %v1689_v5  ;;  %v3757_v15 = vsub.f32 %v1649_v41, %v1690_v6  ;;  %v3759_v17 = vsub.f32 %v1650_v42, %v1691_v7  ;;  %v1708_v24 = vmul.f32 %v3745_v8, %v3745_v8  ;;  %v2836_v39 = vld [vmem:[%s4063_s8 + $0x70] sm:$0xf]  ;;  %v2838_v42 = vld [vmem:[%s4063_s8 + $0x78] sm:$0xf0]  ;;  %v2796_v5 = vld [vmem:[%s4063_s8 + $0x20] sm:$0xf] }
 0x528   : > { %v1709_v20 = vmul.f32 %v3747_v10, %v3747_v10  ;;  %v1710_v21 = vmul.f32 %v3749_v11, %v3749_v11  ;;  %v1711_v22 = vmul.f32 %v3751_v12, %v3751_v12  ;;  %v1712_v23 = vmul.f32 %v3753_v13, %v3753_v13  ;;  %v2983_v6 = vld [vmem:[%s4063_s8 + $0x24] sm:$0xf0]  ;;  %v2982_v7 = vld [vmem:[%s4063_s8 + $0x24] sm:$0xf] }
 0x529   : > { %v1713_v25 = vmul.f32 %v3755_v14, %v3755_v14  ;;  %v1714_v28 = vmul.f32 %v3757_v15, %v3757_v15  ;;  %v1715_v29 = vmul.f32 %v3759_v17, %v3759_v17  ;;  %v2837_v41 = vor.u32 %v2993_v40, %v2836_v39  ;;  %v3009_v39 = vld [vmem:[#allocation9 + $0x78] sm:$0xff] }
 0x52a   : > { %v1724_v27 = vrot.slane %v1709_v20, 7  ;;  %v1726_v9 = vrot.slane %v1710_v21, 6  ;;  %v1728_v30 = vrot.slane %v1711_v22, 5  ;;  %v1730_v31 = vrot.slane %v1712_v23, 4  ;;  %v2798_v20 = vld [vmem:[%s4063_s8 + $0x28] sm:$0xf0]  ;;  %2134 = vmatpush.bf16.msrb.mxu3 %v3009_v39 }
 0x52b   : > { %v1732_v33 = vrot.slane %v1713_v25, 3  ;;  %v1734_v26 = vrot.slane %v1714_v28, 2  ;;  %v1736_v36 = vrot.slane %v1715_v29, 1  ;;  %v2841_v43 = vor.u32 %v2992_v35, %v2838_v42  ;;  %1943 = vmatpush.bf16.msrb.mxu0 %v2837_v41  ;;  %v2788_v25 = vld [vmem:[%s4063_s8 + $0x10] sm:$0xf] }
 0x52c   : > { %v1725_v18 = vsel %vm1544_vm11, %v1724_v27, %v1708_v24  ;;  %v2805_v2 = vor.u32 %v2985_v62, %v2804_v61  ;;  %v2809_v4 = vor.u32 %v2984_v1, %v2806_v3  ;;  %v2797_v22 = vor.u32 %v2983_v6, %v2796_v5  ;;  %v2981_v27 = vld [vmem:[%s4063_s8 + $0x14] sm:$0xf0]  ;;  %v2790_v28 = vld [vmem:[%s4063_s8 + $0x18] sm:$0xf0]  ;;  %v3118_v42 = vld [vmem:[%s4061_s6] ss:$0 sm:$0xff] }
 0x52d   : > { %v1727_v16 = vsel %vm1547_vm12, %v1726_v9, %v1725_v18  ;;  %1956 = vmatpush.bf16.msra.mxu1 %v2841_v43  ;;  %v2801_v24 = vor.u32 %v2982_v7, %v2798_v20  ;;  %v2980_v9 = vld [vmem:[%s4063_s8 + $0x14] sm:$0xf]  ;;  %v2789_v18 = vor.u32 %v2981_v27, %v2788_v25 }
 0x52e   : > { %v1729_v32 = vsel %vm1550_vm13, %v1728_v30, %v1727_v16  ;;  %v2793_v30 = vor.u32 %v2980_v9, %v2790_v28  ;;  %v2780_v16 = vld [vmem:[%s4063_s8] sm:$0xf] }
 0x52f   : > { %v1731_v19 = vsel %vm1553_vm14, %v1730_v31, %v1729_v32  ;;  %1944 = vmatpush.bf16.msrb.mxu0 %v2829_v45  ;;  %v2979_v31 = vld [vmem:[%s4063_s8 + $0x4] sm:$0xf0]  ;;  %v2978_v32 = vld [vmem:[%s4063_s8 + $0x4] sm:$0xf] }
 0x530   : > { %v1733_v34 = vsel %vm1556_vm15, %v1732_v33, %v1731_v19  ;;  %v2782_v33 = vld [vmem:[%s4063_s8 + $0x8] sm:$0xf0]  ;;  %v2781_v19 = vor.u32 %v2979_v31, %v2780_v16 }
 0x531   : > { %v1735_v37 = vsel %vm1559_vm0, %v1734_v26, %v1733_v34  ;;  %1957 = vmatpush.bf16.msra.mxu1 %v2833_v58  ;;  %v2785_v26 = vor.u32 %v2978_v32, %v2782_v33 }
 0x532   : > { %v1737_v38 = vsel %vm1562_vm1, %v1736_v36, %v1735_v37 }
 0x533   : > { %1739 = vadd.xlane.f32.xlu0 %v1737_v38  ;;  %1945 = vmatpush.bf16.msrb.mxu0 %v2821_v47  ;;  %v3001_v38 = vld [vmem:[#allocation9 + $0x38] sm:$0xff] }
 0x534   : > { %2121 = vmatpush.bf16.msrb.mxu2 %v3001_v38 }
 0x535   : > { %1958 = vmatpush.bf16.msra.mxu1 %v2825_v0 }
 0x537   : > { %1946 = vmatpush.bf16.msrb.mxu0 %v2813_v55 }
 0x539   : > { %1959 = vmatpush.bf16.msra.mxu1 %v2817_v57 }
 0x53b   : > { %1947 = vmatpush.bf16.msrb.mxu0 %v2805_v2 }
 0x53d   : > { %1960 = vmatpush.bf16.msra.mxu1 %v2809_v4 }
 0x53f   : > { %1948 = vmatpush.bf16.msrb.mxu0 %v2797_v22 }
 0x541   : > { %1961 = vmatpush.bf16.msra.mxu1 %v2801_v24 }
 0x543   : > { %1949 = vmatpush.bf16.msrb.mxu0 %v2789_v18 }
 0x545   : > { %1962 = vmatpush.bf16.msra.mxu1 %v2793_v30 }
 0x547   : > { %1950 = vmatpush.bf16.msrb.mxu0 %v2781_v19 }
 0x549   : > { %1963 = vmatpush.bf16.msra.mxu1 %v2785_v26 }
 0x5a6   : > { %v1740_v21 = vpop.xlane.xlu0 %1739 }
 0x5a7   : > { %v1741_v23 = vmul.f32 %v1740_v21, %v3742_v60 }
 0x5a9   : > { %v1742_v29 = vadd.f32 1e-05, %v1741_v23 }
 0x5ab   : > { %3160 = vrsqrt.f32 %v1742_v29  ;;  %vm1749_vm4 = vweird.f32 %v1742_v29 }
 0x5b1   : > { %v3161_v34 = vpop.eup %3160 }
 0x5b2   : > { %v1744_v36 = vmul.f32 %v3161_v34, %v1742_v29  ;;  %vm1750_vm3 = vweird.f32 %v3161_v34 }
 0x5b3   : > { %vm1751_vm5 = vmor %vm1749_vm4, %vm1750_vm3 }
 0x5b4   : > { %v1745_v37 = vmul.f32 %v3161_v34, %v1744_v36 }
 0x5b6   : > { %v1746_v40 = vmul.f32 0.5, %v1745_v37 }
 0x5b8   : > { %v1747_v35 = vsub.f32 1.5, %v1746_v40 }
 0x5ba   : > { %v1748_v41 = vmul.f32 %v3161_v34, %v1747_v35 }
 0x5bc   : > { %v1752_v43 = vsel %vm1751_vm5, %v3161_v34, %v1748_v41 }
 0x5bd   : > { %v1754_v44 = vrot.slane %v1752_v43, 1  ;;  %v1755_v49 = vrot.slane %v1752_v43, 2  ;;  %v1756_v53 = vrot.slane %v1752_v43, 3  ;;  %v1757_v45 = vrot.slane %v1752_v43, 4 }
 0x5be   : > { %v1758_v54 = vrot.slane %v1752_v43, 5  ;;  %v1769_v58 = vmul.f32 %v1752_v43, %v3745_v8  ;;  %v1759_v48 = vrot.slane %v1752_v43, 6  ;;  %v1760_v46 = vrot.slane %v1752_v43, 7 }
 0x5bf   : > { %v1770_v47 = vmul.f32 %v1754_v44, %v3747_v10  ;;  %v1771_v63 = vmul.f32 %v1755_v49, %v3749_v11  ;;  %v1772_v0 = vmul.f32 %v1756_v53, %v3751_v12  ;;  %v1773_v50 = vmul.f32 %v1757_v45, %v3753_v13  ;;  %v3000_v44 = vld [vmem:[#allocation9 + $0x30] sm:$0xff]  ;;  %v2999_v53 = vld [vmem:[#allocation9 + $0x28] sm:$0xff] }
 0x5c0   : > { %v1781_v51 = vmul.f32 %v3118_v42, %v1769_v58  ;;  %v1774_v52 = vmul.f32 %v1758_v54, %v3755_v14  ;;  %v1775_v55 = vmul.f32 %v1759_v48, %v3757_v15  ;;  %v1776_v8 = vmul.f32 %v1760_v46, %v3759_v17  ;;  %v3008_v49 = vld [vmem:[#allocation9 + $0x70] sm:$0xff]  ;;  %2122 = vmatpush.bf16.msrb.mxu2 %v3000_v44  ;;  %v3007_v45 = vld [vmem:[#allocation9 + $0x68] sm:$0xff]  ;;  %v2998_v54 = vld [vmem:[#allocation9 + $0x20] sm:$0xff] }
 0x5c1   : > { %v1782_v56 = vmul.f32 %v3118_v42, %v1770_v47  ;;  %v1783_v57 = vmul.f32 %v3118_v42, %v1771_v63  ;;  %v1784_v61 = vmul.f32 %v3118_v42, %v1772_v0  ;;  %v1785_v62 = vmul.f32 %v3118_v42, %v1773_v50  ;;  %2135 = vmatpush.bf16.msrb.mxu3 %v3008_v49  ;;  %v3006_v58 = vld [vmem:[#allocation9 + $0x60] sm:$0xff]  ;;  %v2997_v48 = vld [vmem:[#allocation9 + $0x18] sm:$0xff]  ;;  %v3004_v47 = vld [vmem:[#allocation9 + $0x50] sm:$0xff] }
 0x5c2   : > { %v1786_v1 = vmul.f32 %v3118_v42, %v1774_v52  ;;  %v1787_v2 = vmul.f32 %v3118_v42, %v1775_v55  ;;  %v1788_v10 = vmul.f32 %v3118_v42, %v1776_v8  ;;  %v3895_v3 = vadd.f32 %v3119_v59, %v1781_v51  ;;  %v3005_v46 = vld [vmem:[#allocation9 + $0x58] sm:$0xff]  ;;  %v2995_v63 = vld [vmem:[#allocation9 + $0x8] sm:$0xff]  ;;  %v2994_v50 = vld [vmem:[#allocation9] sm:$0xff] }
 0x5c3   : > { %v3897_v11 = vadd.f32 %v3119_v59, %v1782_v56  ;;  %v3899_v12 = vadd.f32 %v3119_v59, %v1783_v57  ;;  %v3901_v13 = vadd.f32 %v3119_v59, %v1784_v61  ;;  %v3903_v14 = vadd.f32 %v3119_v59, %v1785_v62  ;;  %v3003_v0 = vld [vmem:[#allocation9 + $0x48] sm:$0xff]  ;;  %v3002_v51 = vld [vmem:[#allocation9 + $0x40] sm:$0xff] }
 0x5c4   : > { %v3905_v15 = vadd.f32 %v3119_v59, %v1786_v1  ;;  %v3907_v17 = vadd.f32 %v3119_v59, %v1787_v2  ;;  %v3909_v4 = vadd.f32 %v3119_v59, %v1788_v10  ;;  %v1801_v5 = vpack.c.bf16 %v3895_v3, %v3895_v3  ;;  %2123 = vmatpush.bf16.msrb.mxu2 %v2999_v53  ;;  %v2996_v59 = vld [vmem:[#allocation9 + $0x10] sm:$0xff]  ;;  %v1825_v52 = vld [vmem:[%s4064_s9] sm:$0x3] }
 0x5c5   : > { %v1802_v6 = vpack.c.bf16 %v3897_v11, %v3897_v11  ;;  %v1803_v7 = vpack.c.bf16 %v3899_v12, %v3899_v12  ;;  %v1804_v20 = vpack.c.bf16 %v3901_v13, %v3901_v13  ;;  %v1805_v21 = vpack.c.bf16 %v3903_v14, %v3903_v14  ;;  %2136 = vmatpush.bf16.msrb.mxu3 %v3007_v45 }
 0x5c6   : > { %v1806_v22 = vpack.c.bf16 %v3905_v15, %v3905_v15  ;;  %v1807_v23 = vpack.c.bf16 %v3907_v17, %v3907_v17  ;;  %v1808_v24 = vpack.c.bf16 %v3909_v4, %v3909_v4  ;;  %v1839_v29 = vunpack.c.l.b16 %v1801_v5 }
 0x5c7   : > { %v1840_v25 = vunpack.c.l.b16 %v1802_v6  ;;  %v1841_v27 = vunpack.c.l.b16 %v1803_v7  ;;  %v1842_v9 = vunpack.c.l.b16 %v1804_v20  ;;  %v1843_v28 = vunpack.c.l.b16 %v1805_v21 }
 0x5c8   : > { %v1844_v18 = vunpack.c.l.b16 %v1806_v22  ;;  %v1845_v31 = vunpack.c.l.b16 %v1807_v23  ;;  %v1846_v32 = vunpack.c.l.b16 %v1808_v24  ;;  %2124 = vmatpush.bf16.msrb.mxu2 %v2998_v54  ;;  %v1827_v55 = vperm.slane %v1825_v52, 0 }
 0x5c9   : > { %v1847_v30 = vrot.slane %v1840_v25, 7  ;;  %v1849_v16 = vrot.slane %v1841_v27, 6  ;;  %v1851_v19 = vrot.slane %v1842_v9, 5  ;;  %v1853_v34 = vrot.slane %v1843_v28, 4  ;;  %2137 = vmatpush.bf16.msrb.mxu3 %v3006_v58 }
 0x5ca   : > { %v1855_v37 = vrot.slane %v1844_v18, 3  ;;  %v1857_v39 = vrot.slane %v1845_v31, 2  ;;  %v1859_v35 = vrot.slane %v1846_v32, 1  ;;  %v1828_v8 = vperm.slane %v1825_v52, 1 }
 0x5cb   : > { %v1848_v33 = vsel %vm1544_vm11, %v1847_v30, %v1839_v29 }
 0x5cc   : > { %v1850_v26 = vsel %vm1547_vm12, %v1849_v16, %v1848_v33  ;;  %2125 = vmatpush.bf16.msrb.mxu2 %v2997_v48 }
 0x5cd   : > { %v1852_v36 = vsel %vm1550_vm13, %v1851_v19, %v1850_v26  ;;  %2138 = vmatpush.bf16.msrb.mxu3 %v3005_v46  ;;  %v3120_v19 = vld [vmem:[%s4066_s11] ss:$0 sm:$0xff] }
 0x5ce   : > { %v1854_v38 = vsel %vm1553_vm14, %v1853_v34, %v1852_v36 }
 0x5cf   : > { %v1856_v40 = vsel %vm1556_vm15, %v1855_v37, %v1854_v38 }
 0x5d0   : > { %v1858_v41 = vsel %vm1559_vm0, %v1857_v39, %v1856_v40  ;;  %2126 = vmatpush.bf16.msrb.mxu2 %v2996_v59 }
 0x5d1   : > { %v1860_v42 = vsel %vm1562_vm1, %v1859_v35, %v1858_v41  ;;  %2139 = vmatpush.bf16.msrb.mxu3 %v3004_v47 }
 0x5d2   : > { %v1861_v43 = vpack.c.b16 %v1860_v42, %v1860_v42 }
 0x5d4   : > { %1951 = vmatmul.bf16.vlgmr.msrb.gmra.mxu0 %v1861_v43  ;;  %1964 = vmatmul.bf16.vlgmr.msra.gmra.mxu1 %v1861_v43 }
 0x5d5   : > { %2127 = vmatpush.bf16.msrb.mxu2 %v2995_v63  ;;  %2140 = vmatpush.bf16.msrb.mxu3 %v3003_v0 }
 0x5d9   : > { %2128 = vmatpush.bf16.msrb.mxu2 %v2994_v50  ;;  %2141 = vmatpush.bf16.msrb.mxu3 %v3002_v51 }
 0x651   : > { %v1952_v56 = vpop.f32.mrf.mxu0  ;;  %v1965_v57 = vpop.f32.mrf.mxu1 }
 0x652   : > { %v1953_v61 = vadd.f32 %v1952_v56, %v1827_v55  ;;  %v1966_v62 = vadd.f32 %v1965_v57, %v1828_v8 }
 0x654   : > { %v1969_v1 = vmul.f32 %v1953_v61, %v1953_v61  ;;  %v1970_v2 = vmul.f32 %v1966_v62, %v1966_v62 }
 0x656   : > { %v1971_v10 = vmul.f32 %v1969_v1, %v1953_v61  ;;  %v1972_v5 = vmul.f32 %v1970_v2, %v1966_v62 }
 0x658   : > { %v1973_v6 = vmul.f32 0.044715, %v1971_v10  ;;  %v1974_v7 = vmul.f32 0.044715, %v1972_v5 }
 0x659   : > { %v1954_v20 = vpop.f32.mrf.mxu0  ;;  %v1967_v21 = vpop.f32.mrf.mxu1 }
 0x65a   : > { %v1975_v22 = vadd.f32 %v1973_v6, %v1953_v61  ;;  %v1976_v23 = vadd.f32 %v1974_v7, %v1966_v62 }
 0x65c   : > { %v1977_v24 = vmul.f32 0.7978846, %v1975_v22  ;;  %v1978_v25 = vmul.f32 0.7978846, %v1976_v23 }
 0x65e   : > { %3162 = vtanh.f32 %v1977_v24 }
 0x65f   : > { %3164 = vtanh.f32 %v1978_v25 }
 0x664   : > { %v3163_v27 = vpop.eup %3162 }
 0x665   : > { %v3165_v9 = vpop.eup %3164  ;;  %v1981_v28 = vadd.f32 1.0, %v3163_v27 }
 0x666   : > { %v1982_v29 = vadd.f32 1.0, %v3165_v9 }
 0x667   : > { %v1983_v18 = vmul.f32 0.5, %v1981_v28 }
 0x668   : > { %v1984_v30 = vmul.f32 0.5, %v1982_v29 }
 0x669   : > { %v1985_v16 = vmul.f32 %v1983_v18, %v1953_v61 }
 0x66a   : > { %v1986_v31 = vmul.f32 %v1984_v30, %v1966_v62 }
 0x66b   : > { %v1987_v32 = vpack.c.bf16 %v1985_v16, %v1985_v16 }
 0x66c   : > { %v1988_v33 = vpack.c.bf16 %v1986_v31, %v1986_v31 }
 0x66d   : > { %2129 = vmatmul.bf16.vlgmr.msrb.gmra.mxu2 %v1987_v32 }
 0x66e   : > { %2142 = vmatmul.bf16.vlgmr.msrb.gmra.mxu3 %v1988_v33 }
 0x6f0   : > { %v2130_v26 = vpop.f32.mrf.mxu2 }
 0x6f1   : > { %v2131_v34 = vadd.f32 %v3120_v19, %v2130_v26  ;;  %v2143_v36 = vpop.f32.mrf.mxu3 }
 0x6f3   : > { %v2144_v37 = vadd.f32 %v2143_v36, %v2131_v34 }
 0x6f5   : > { %v2148_v38 = vrot.slane %v2144_v37, 1  ;;  %v2149_v39 = vrot.slane %v2144_v37, 2  ;;  %v2150_v40 = vrot.slane %v2144_v37, 3  ;;  %v2151_v35 = vrot.slane %v2144_v37, 4 }
 0x6f6   : > { %v2152_v41 = vrot.slane %v2144_v37, 5  ;;  %v2153_v42 = vrot.slane %v2144_v37, 6  ;;  %v2154_v43 = vrot.slane %v2144_v37, 7  ;;  %v2163_v48 = vadd.f32 %v2144_v37, %v3895_v3 }
 0x6f7   : > { %v2164_v44 = vadd.f32 %v2148_v38, %v3897_v11  ;;  %v2165_v49 = vadd.f32 %v2149_v39, %v3899_v12  ;;  %v2166_v53 = vadd.f32 %v2150_v40, %v3901_v13  ;;  %v2167_v54 = vadd.f32 %v2151_v35, %v3903_v14 }
 0x6f8   : > { %v2132_v45 = vpop.f32.mrf.mxu2  ;;  %v2168_v46 = vadd.f32 %v2152_v41, %v3905_v15  ;;  %v2169_v63 = vadd.f32 %v2153_v42, %v3907_v17  ;;  %v2170_v0 = vadd.f32 %v2154_v43, %v3909_v4 }
 0x6f9   : > { %v2145_v58 = vpop.f32.mrf.mxu3  ;;  %v2179_v59 = vrot.slane %v2164_v44, 7  ;;  %v2181_v47 = vrot.slane %v2165_v49, 6  ;;  %v2183_v50 = vrot.slane %v2166_v53, 5  ;;  %v2185_v13 = vrot.slane %v2167_v54, 4  ;;  %v3014_v45 = vld [vmem:[#allocation11 + $0x20] sm:$0xff] }
 0x6fa   : > { %v2187_v14 = vrot.slane %v2168_v46, 3  ;;  %v2189_v3 = vrot.slane %v2169_v63, 2  ;;  %v2191_v55 = vrot.slane %v2170_v0, 1 }
 0x6fb   : > { %v2180_v11 = vsel %vm1544_vm11, %v2179_v59, %v2163_v48 }
 0x6fc   : > { %v2182_v12 = vsel %vm1547_vm12, %v2181_v47, %v2180_v11  ;;  %v3011_v47 = vld [vmem:[#allocation11 + $0x8] sm:$0xff] }
 0x6fd   : > { %v2184_v51 = vsel %vm1550_vm13, %v2183_v50, %v2182_v12 }
 0x6fe   : > { %v2186_v52 = vsel %vm1553_vm14, %v2185_v13, %v2184_v51 }
 0x6ff   : > { %v2188_v15 = vsel %vm1556_vm15, %v2187_v14, %v2186_v52 }
 0x700   : > { %v2190_v8 = vsel %vm1559_vm0, %v2189_v3, %v2188_v15 }
 0x701   : > { %v2192_v17 = vsel %vm1562_vm1, %v2191_v55, %v2190_v8 }
 0x702   : > { %2194 = vadd.xlane.f32.xlu1 %v2192_v17 }
 0x775   : > { %v2195_v4 = vpop.xlane.xlu1 %2194 }
 0x776   : > { %v2196_v56 = vmul.f32 %v2195_v4, %v3742_v60 }
 0x778   : > { %v2198_v57 = vrot.slane %v2196_v56, 1  ;;  %v2199_v61 = vrot.slane %v2196_v56, 2  ;;  %v2200_v62 = vrot.slane %v2196_v56, 3  ;;  %v2201_v1 = vrot.slane %v2196_v56, 4 }
 0x779   : > { %v2202_v2 = vrot.slane %v2196_v56, 5  ;;  %v2203_v10 = vrot.slane %v2196_v56, 6  ;;  %v2204_v5 = vrot.slane %v2196_v56, 7  ;;  %v3956_v6 = vsub.f32 %v2163_v48, %v2196_v56  ;;  %v3012_v48 = vld [vmem:[#allocation11 + $0x10] sm:$0xff] }
 0x77a   : > { %v3958_v7 = vsub.f32 %v2164_v44, %v2198_v57  ;;  %v3960_v20 = vsub.f32 %v2165_v49, %v2199_v61  ;;  %v3962_v21 = vsub.f32 %v2166_v53, %v2200_v62  ;;  %v3964_v22 = vsub.f32 %v2167_v54, %v2201_v1  ;;  %v3017_v44 = vld [vmem:[#allocation11 + $0x38] sm:$0xff]  ;;  %v3016_v49 = vld [vmem:[#allocation11 + $0x30] sm:$0xff]  ;;  %v3015_v53 = vld [vmem:[#allocation11 + $0x28] sm:$0xff] }
 0x77b   : > { %v3966_v23 = vsub.f32 %v2168_v46, %v2202_v2  ;;  %v3968_v24 = vsub.f32 %v2169_v63, %v2203_v10  ;;  %v3970_v25 = vsub.f32 %v2170_v0, %v2204_v5  ;;  %v2221_v18 = vmul.f32 %v3956_v6, %v3956_v6  ;;  %2422 = vmatpush.bf16.msra.mxu0 %v3017_v44  ;;  %v3013_v54 = vld [vmem:[#allocation11 + $0x18] sm:$0xff]  ;;  %v3010_v63 = vld [vmem:[#allocation11] sm:$0xff] }
 0x77c   : > { %v2222_v27 = vmul.f32 %v3958_v7, %v3958_v7  ;;  %v2223_v9 = vmul.f32 %v3960_v20, %v3960_v20  ;;  %v2224_v28 = vmul.f32 %v3962_v21, %v3962_v21  ;;  %v2225_v29 = vmul.f32 %v3964_v22, %v3964_v22  ;;  %v3122_v57 = vld [vmem:[%s4068_s13] ss:$0 sm:$0xff] }
 0x77d   : > { %v2226_v30 = vmul.f32 %v3966_v23, %v3966_v23  ;;  %v2227_v32 = vmul.f32 %v3968_v24, %v3968_v24  ;;  %v2228_v33 = vmul.f32 %v3970_v25, %v3970_v25 }
 0x77e   : > { %v2237_v16 = vrot.slane %v2222_v27, 7  ;;  %v2239_v31 = vrot.slane %v2223_v9, 6  ;;  %v2241_v26 = vrot.slane %v2224_v28, 5  ;;  %v2243_v36 = vrot.slane %v2225_v29, 4 }
 0x77f   : > { %v2245_v38 = vrot.slane %v2226_v30, 3  ;;  %v2247_v40 = vrot.slane %v2227_v32, 2  ;;  %v2249_v41 = vrot.slane %v2228_v33, 1  ;;  %2423 = vmatpush.bf16.msra.mxu0 %v3016_v49 }
 0x780   : > { %v2238_v19 = vsel %vm1544_vm11, %v2237_v16, %v2221_v18 }
 0x781   : > { %v2240_v34 = vsel %vm1547_vm12, %v2239_v31, %v2238_v19 }
 0x782   : > { %v2242_v37 = vsel %vm1550_vm13, %v2241_v26, %v2240_v34 }
 0x783   : > { %v2244_v39 = vsel %vm1553_vm14, %v2243_v36, %v2242_v37  ;;  %2424 = vmatpush.bf16.msra.mxu0 %v3015_v53 }
 0x784   : > { %v2246_v35 = vsel %vm1556_vm15, %v2245_v38, %v2244_v39 }
 0x785   : > { %v2248_v42 = vsel %vm1559_vm0, %v2247_v40, %v2246_v35 }
 0x786   : > { %v2250_v43 = vsel %vm1562_vm1, %v2249_v41, %v2248_v42 }
 0x787   : > { %2252 = vadd.xlane.f32.xlu2 %v2250_v43  ;;  %2425 = vmatpush.bf16.msra.mxu0 %v3014_v45 }
 0x78b   : > { %2426 = vmatpush.bf16.msra.mxu0 %v3013_v54 }
 0x78f   : > { %2427 = vmatpush.bf16.msra.mxu0 %v3012_v48 }
 0x793   : > { %2428 = vmatpush.bf16.msra.mxu0 %v3011_v47 }
 0x797   : > { %2429 = vmatpush.bf16.msra.mxu0 %v3010_v63 }
 0x7fa   : > { %v2253_v58 = vpop.xlane.xlu2 %2252 }
 0x7fb   : > { %v2254_v46 = vmul.f32 %v2253_v58, %v3742_v60  ;;  %v3121_v60 = vld [vmem:[%s4067_s12] ss:$0 sm:$0xff] }
 0x7fd   : > { %v2255_v59 = vadd.f32 1e-05, %v2254_v46 }
 0x7ff   : > { %3166 = vrsqrt.f32 %v2255_v59  ;;  %vm2262_vm7 = vweird.f32 %v2255_v59 }
 0x805   : > { %v3167_v0 = vpop.eup %3166 }
 0x806   : > { %v2257_v11 = vmul.f32 %v3167_v0, %v2255_v59  ;;  %vm2263_vm6 = vweird.f32 %v3167_v0 }
 0x807   : > { %vm2264_vm8 = vmor %vm2262_vm7, %vm2263_vm6 }
 0x808   : > { %v2258_v50 = vmul.f32 %v3167_v0, %v2257_v11 }
 0x80a   : > { %v2259_v12 = vmul.f32 0.5, %v2258_v50 }
 0x80c   : > { %v2260_v13 = vsub.f32 1.5, %v2259_v12 }
 0x80e   : > { %v2261_v51 = vmul.f32 %v3167_v0, %v2260_v13 }
 0x810   : > { %v2265_v14 = vsel %vm2264_vm8, %v3167_v0, %v2261_v51 }
 0x811   : > { %v2267_v52 = vrot.slane %v2265_v14, 1  ;;  %v2268_v3 = vrot.slane %v2265_v14, 2  ;;  %v2269_v15 = vrot.slane %v2265_v14, 3  ;;  %v2270_v55 = vrot.slane %v2265_v14, 4 }
 0x812   : > { %v2282_v8 = vmul.f32 %v2265_v14, %v3956_v6  ;;  %v2271_v17 = vrot.slane %v2265_v14, 5  ;;  %v2272_v4 = vrot.slane %v2265_v14, 6  ;;  %v2273_v56 = vrot.slane %v2265_v14, 7  ;;  %v3123_v14 = vld [vmem:[%s4070_s15] ss:$0 sm:$0xff] }
 0x813   : > { %v2283_v61 = vmul.f32 %v2267_v52, %v3958_v7  ;;  %v2284_v62 = vmul.f32 %v2268_v3, %v3960_v20  ;;  %v2285_v1 = vmul.f32 %v2269_v15, %v3962_v21  ;;  %v2286_v2 = vmul.f32 %v2270_v55, %v3964_v22  ;;  %v3124_v15 = vld [vmem:[%s4071_s16] ss:$0 sm:$0xff] }
 0x814   : > { %v2294_v10 = vmul.f32 %v3121_v60, %v2282_v8  ;;  %v2287_v5 = vmul.f32 %v2271_v17, %v3966_v23  ;;  %v2288_v6 = vmul.f32 %v2272_v4, %v3968_v24  ;;  %v2289_v27 = vmul.f32 %v2273_v56, %v3970_v25  ;;  %v3125_v4 = vld [vmem:[#allocation2] ss:$0 sm:$0xff] }
 0x815   : > { %v2295_v9 = vmul.f32 %v3121_v60, %v2283_v61  ;;  %v2296_v28 = vmul.f32 %v3121_v60, %v2284_v62  ;;  %v2297_v29 = vmul.f32 %v3121_v60, %v2285_v1  ;;  %v2298_v18 = vmul.f32 %v3121_v60, %v2286_v2 }
 0x816   : > { %v2299_v30 = vmul.f32 %v3121_v60, %v2287_v5  ;;  %v2300_v16 = vmul.f32 %v3121_v60, %v2288_v6  ;;  %v2301_v7 = vmul.f32 %v3121_v60, %v2289_v27  ;;  %v2306_v31 = vadd.f32 %v3122_v57, %v2294_v10 }
 0x817   : > { %v2307_v20 = vadd.f32 %v3122_v57, %v2295_v9  ;;  %v2308_v32 = vadd.f32 %v3122_v57, %v2296_v28  ;;  %v2309_v21 = vadd.f32 %v3122_v57, %v2297_v29  ;;  %v2310_v33 = vadd.f32 %v3122_v57, %v2298_v18 }
 0x818   : > { %v2311_v22 = vadd.f32 %v3122_v57, %v2299_v30  ;;  %v2312_v19 = vadd.f32 %v3122_v57, %v2300_v16  ;;  %v2313_v26 = vadd.f32 %v3122_v57, %v2301_v7  ;;  %v2314_v23 = vpack.c.bf16 %v2306_v31, %v2306_v31 }
 0x819   : > { %v2315_v34 = vpack.c.bf16 %v2307_v20, %v2307_v20  ;;  %v2316_v24 = vpack.c.bf16 %v2308_v32, %v2308_v32  ;;  %v2317_v36 = vpack.c.bf16 %v2309_v21, %v2309_v21  ;;  %v2318_v25 = vpack.c.bf16 %v2310_v33, %v2310_v33 }
 0x81a   : > { %v2319_v37 = vpack.c.bf16 %v2311_v22, %v2311_v22  ;;  %v2320_v38 = vpack.c.bf16 %v2312_v19, %v2312_v19  ;;  %v2321_v39 = vpack.c.bf16 %v2313_v26, %v2313_v26  ;;  %v2350_v43 = vunpack.c.l.b16 %v2314_v23 }
 0x81b   : > { %v2351_v40 = vunpack.c.l.b16 %v2315_v34  ;;  %v2352_v35 = vunpack.c.l.b16 %v2316_v24  ;;  %v2353_v41 = vunpack.c.l.b16 %v2317_v36  ;;  %v2354_v42 = vunpack.c.l.b16 %v2318_v25 }
 0x81c   : > { %v2355_v44 = vunpack.c.l.b16 %v2319_v37  ;;  %v2356_v45 = vunpack.c.l.b16 %v2320_v38  ;;  %v2357_v54 = vunpack.c.l.b16 %v2321_v39 }
 0x81d   : > { %v2358_v49 = vrot.slane %v2351_v40, 7  ;;  %v2360_v53 = vrot.slane %v2352_v35, 6  ;;  %v2362_v48 = vrot.slane %v2353_v41, 5  ;;  %v2364_v59 = vrot.slane %v2354_v42, 4 }
 0x81e   : > { %v2366_v63 = vrot.slane %v2355_v44, 3  ;;  %v2368_v11 = vrot.slane %v2356_v45, 2  ;;  %v2370_v12 = vrot.slane %v2357_v54, 1 }
 0x81f   : > { %v2359_v58 = vsel %vm1544_vm11, %v2358_v49, %v2350_v43 }
 0x820   : > { %v2361_v46 = vsel %vm1547_vm12, %v2360_v53, %v2359_v58 }
 0x821   : > { %v2363_v47 = vsel %vm1550_vm13, %v2362_v48, %v2361_v46 }
 0x822   : > { %v2365_v0 = vsel %vm1553_vm14, %v2364_v59, %v2363_v47 }
 0x823   : > { %v2367_v50 = vsel %vm1556_vm15, %v2366_v63, %v2365_v0 }
 0x824   : > { %v2369_v13 = vsel %vm1559_vm0, %v2368_v11, %v2367_v50 }
 0x825   : > { %v2371_v51 = vsel %vm1562_vm1, %v2370_v12, %v2369_v13 }
 0x826   : > { %v2372_v60 = vpack.c.b16 %v2371_v51, %v2371_v51 }
 0x828   : > { %2430 = vmatmul.bf16.vlgmr.msra.gmra.mxu0 %v2372_v60 }
 0x8a5   : > { %v2431_v52 = vpop.f32.mrf.mxu0 }
 0x8a6   : > { %v2432_v3 = vadd.f32 %v3123_v14, %v2431_v52 }
 0x8a8   : > { %3168 = vtanh.f32 %v2432_v3 }
 0x8ad   : > { %v2433_v55 = vpop.f32.mrf.mxu0 }
 0x8ae   : > { %v3169_v8 = vpop.eup %3168 }
 0x8af   : > { %v2440_v17 = vmul.f32 %v3169_v8, %v3124_v15 }
 0x8b1   : > { %2441 = vadd.xlane.f32.xlu0 %v2440_v17 }
 0x924   : > { %v2442_v56 = vpop.xlane.xlu0 %2441 }
 0x925   : > { %v2447_v57 = vadd.f32 %v3125_v4, %v2442_v56 }
 0x927   : > { %2450 = vperm.xlu1 %3116, %v2447_v57  }
 0x999   : > { %v2451_v61 = vpop.permute.xlu1 %2450 }
 0x99a   : > { %2453 = vst [vmem:[%s668_s20] sm:$0xff] %v2451_v61 }
 0x99b   : > { %3347 = shalt.err (!%p3344_p8)
}
 0x99c   : > { %3038 = dma.vmem_to_hbm [thread:$0]  (%p3544_p5), %s2468_s10, 128, %s2470_s19, %s2455_s23  }
 0x99d PF: > { %s4107_s21 = sld [smem:[#allocation19_spill]] }
 0x99e   : > { %s4108_s4 = sld [smem:[#allocation17_spill]] }
 0x9a3   : > { %p3070_p9 = scmp.ge.s32.totalorder %s4107_s21, 2 }
 0x9a4   : > { %s2481_s24 = sand.u32 1, %s4108_s4  }
 0x9a5   : > { %p3057_p10 = pnand %p3070_p9, %p3548_p6  ;;  %s2482_s27 = scalar_lea.sflag [#allocation5], %s2481_s24 }
 0x9a7   : > { %p3058_p11 = pneg %p3057_p10 }
 0x9a9   : > { %3377 = dma.done.wait (%p3058_p11), %s2482_s27, 128  }
 0x9aa   : > { %3379 = vsyncadd (%p3058_p11), %s2482_s27, 4294967168  ;;  %s4110_s19 = sld [smem:[#allocation20_spill]]  ;;  %s4113_s29 = smov %s3386_s30 }
 0x9ab   : > { %s4111_s20 = sld [smem:[#allocation18_spill]] }
 0x9ac   : > { %s4112_s0 = sld [smem:[#allocation21_spill]] }
 0x9b0   : > { %p33_p12 = scmp.ge.s32.totalorder %s4110_s19, 4  }
 0x9b1   : > { %s4114_s30 = smov %s4111_s20 }
 0x9b2   :  { %35 = sbr.rel (!%p33_p12) target bundleno = 13 (0xd), region = 151 }
 0x9b7   :  { %2488 = vsyncpa [#allocation4], 1 }
 0x9b8   :  { %2490 = vsyncpa [#allocation4 + $0x1], 1 }
 0x9b9   :  { %2491 = vsyncpa [#allocation7], 1 }
 0x9ba   :  { %2492 = vsyncpa [#allocation10], 1 }
 0x9bb   :  { %2493 = vsyncpa [#allocation5], 1 }
 0x9bc   :  { %2495 = vsyncpa [#allocation5 + $0x1], 1 }

</bundles_post_ra>
